<compile_context>
chip_gen: v7x
topology: tpu7x:2x2x1
jax: 0.10.0
libtpu: 0.0.40
codegen_flags: <defaults>
</compile_context>

<pallas_src>
import jax
import jax.numpy as jnp
from jax.experimental import pallas as pl
from jax.experimental.pallas import tpu as pltpu

# ----------------------------------------------------------------------------
# Globals the PyTorch module references (small & deterministic).
# ----------------------------------------------------------------------------
FFT_SIZE = 32
HOP_SIZE = 16
# torch.hann_window default is periodic:
WINDOW = 0.5 * (1.0 - jnp.cos(2.0 * jnp.pi * jnp.arange(FFT_SIZE) / FFT_SIZE))
WINDOW = WINDOW.astype(jnp.float32)
N_FREQ = FFT_SIZE // 2 + 1          # 17
F_PAD = 128                         # lane-dense padded frequency axis


# ----------------------------------------------------------------------------
# Pallas kernel: 2-layer GRU (batch_first semantics) + Linear + Sigmoid.
# One batch element per grid step.
# ----------------------------------------------------------------------------
def _gru_decoder_kernel(x_ref,
                        w0i_ref, w0h_ref, b0_ref,
                        w1i_ref, w1h_ref, b1_ref,
                        wd_ref, bd_ref,
                        mask_ref,
                        gi_scr, h1_scr):
    # x_ref:    (1, T, Fp) bf16   padded magnitude spectrogram (one sequence)
    # w0i:      (Fp, 4H)   bf16   layer-0 input weights,  cols [r | z | n_x | 0 ]
    # w0h:      (H,  4H)   bf16   layer-0 hidden weights, cols [r | z | 0  | n_h]
    # b0:       (1,  4H)   f32    [bi_r+bh_r | bi_z+bh_z | bi_n | bh_n]
    # w1i/w1h/b1: same layout for layer 1 (input size H)
    # wd:       (H, Fp)    bf16   decoder Linear weight (transposed, zero-padded)
    # bd:       (1, Fp)    f32
    # mask_ref: (1, T, Fp) f32    sigmoid mask output
    # gi_scr:   (T, 4H)    f32    precomputed layer-0 input projection
    # h1_scr:   (T, H)     f32    collected layer-1 hidden states
    T = x_ref.shape[1]
    H = w0h_ref.shape[0]
    f32, bf16 = jnp.float32, jnp.bfloat16

    # ---- hoisted layer-0 input projection for ALL timesteps (one MXU op),
    #      with every layer-0 bias pre-added (n-gate split kept). ----
    x = x_ref[0]                                                # (T, Fp) bf16
    gi_scr[...] = (jnp.dot(x, w0i_ref[...], preferred_element_type=f32)
                   + b0_ref[...])

    w0h = w0h_ref[...]
    w1i = w1i_ref[...]
    w1h = w1h_ref[...]
    b1 = b1_ref[...]

    def gru_update(g, h_prev):
        # g columns: [r | z | n_from_input | n_from_hidden], each H wide.
        r = jax.nn.sigmoid(g[:, 0 * H:1 * H])
        z = jax.nn.sigmoid(g[:, 1 * H:2 * H])
        n = jnp.tanh(g[:, 2 * H:3 * H] + r * g[:, 3 * H:4 * H])
        return (1.0 - z) * n + z * h_prev

    # ---- recurrence: fully unrolled static-T loop, h0/h1 stay in vregs ----
    # TODO(synk): for long sequences switch to a partially unrolled
    # lax.fori_loop and/or a T-tiled grid with the hidden state persisted in
    # VMEM scratch under pl.when(program_id == 0) initialization.
    h0 = jnp.zeros((1, H), f32)
    h1 = jnp.zeros((1, H), f32)
    for t in range(T):
        g0 = gi_scr[pl.ds(t, 1)] + jnp.dot(
            h0.astype(bf16), w0h, preferred_element_type=f32)
        h0 = gru_update(g0, h0)
        g1 = (jnp.dot(h0.astype(bf16), w1i, preferred_element_type=f32)
              + jnp.dot(h1.astype(bf16), w1h, preferred_element_type=f32)
              + b1)
        h1 = gru_update(g1, h1)
        h1_scr[pl.ds(t, 1)] = h1

    # ---- batched decoder: one matmul + sigmoid + one lane-dense store ----
    logits = (jnp.dot(h1_scr[...].astype(bf16), wd_ref[...],
                      preferred_element_type=f32) + bd_ref[...])
    mask_ref[0] = jax.nn.sigmoid(logits).astype(mask_ref.dtype)


# ----------------------------------------------------------------------------
# Weight repacking: PyTorch (r,z,n) layout -> fused 4-gate, lane-padded bf16.
# ----------------------------------------------------------------------------
def _pack_params(params):
    H = params["whh0"].shape[0]
    F = params["wih0"].shape[0]
    bf16 = jnp.bfloat16

    def four_i(w):        # (in, 3H) -> (in, 4H): [r | z | n | 0]
        return jnp.concatenate(
            [w, jnp.zeros((w.shape[0], H), w.dtype)], axis=1)

    def four_h(w):        # (in, 3H) -> (in, 4H): [r | z | 0 | n]
        return jnp.concatenate(
            [w[:, :2 * H], jnp.zeros((w.shape[0], H), w.dtype), w[:, 2 * H:]],
            axis=1)

    def four_b(b_ih, b_hh):   # (1, 4H): [bi_r+bh_r | bi_z+bh_z | bi_n | bh_n]
        return jnp.concatenate(
            [b_ih[:, :2 * H] + b_hh[:, :2 * H],
             b_ih[:, 2 * H:], b_hh[:, 2 * H:]], axis=1).astype(jnp.float32)

    w0i = jnp.pad(four_i(params["wih0"]), ((0, F_PAD - F), (0, 0)))
    w0h = four_h(params["whh0"])
    b0 = four_b(params["bih0"], params["bhh0"])
    w1i = four_i(params["wih1"])
    w1h = four_h(params["whh1"])
    b1 = four_b(params["bih1"], params["bhh1"])
    wd = jnp.pad(params["wdec"], ((0, 0), (0, F_PAD - F)))
    bd = jnp.pad(params["bdec"], ((0, 0), (0, F_PAD - F))).astype(jnp.float32)

    return (w0i.astype(bf16), w0h.astype(bf16), b0,
            w1i.astype(bf16), w1h.astype(bf16), b1,
            wd.astype(bf16), bd)


def predict_mask(magnitude, params):
    """magnitude: (B, T, F) f32 -> sigmoid mask (B, T, F) via the Pallas kernel."""
    B, T, F = magnitude.shape
    H = params["whh0"].shape[0]
    G = 4 * H
    w0i, w0h, b0, w1i, w1h, b1, wd, bd = _pack_params(params)

    # Lane-dense input: pad F -> 128, bf16 operands for the MXU.
    x = jnp.pad(magnitude, ((0, 0), (0, 0), (0, F_PAD - F))).astype(jnp.bfloat16)

    mask_pad = pl.pallas_call(
        _gru_decoder_kernel,
        out_shape=jax.ShapeDtypeStruct((B, T, F_PAD), jnp.float32),
        grid=(B,),
        in_specs=[
            pl.BlockSpec((1, T, F_PAD), lambda b: (b, 0, 0)),    # x
            pl.BlockSpec((F_PAD, G), lambda b: (0, 0)),          # w0i
            pl.BlockSpec((H, G), lambda b: (0, 0)),              # w0h
            pl.BlockSpec((1, G), lambda b: (0, 0)),              # b0
            pl.BlockSpec((H, G), lambda b: (0, 0)),              # w1i
            pl.BlockSpec((H, G), lambda b: (0, 0)),              # w1h
            pl.BlockSpec((1, G), lambda b: (0, 0)),              # b1
            pl.BlockSpec((H, F_PAD), lambda b: (0, 0)),          # wd
            pl.BlockSpec((1, F_PAD), lambda b: (0, 0)),          # bd
        ],
        out_specs=pl.BlockSpec((1, T, F_PAD), lambda b: (b, 0, 0)),
        scratch_shapes=[pltpu.VMEM((T, G), jnp.float32),   # precomputed gi0
                        pltpu.VMEM((T, H), jnp.float32)],  # collected h1
        compiler_params=pltpu.CompilerParams(
            dimension_semantics=("parallel",)),            # both v7x TCs
    )(x, w0i, w0h, b0, w1i, w1h, b1, wd, bd)
    return mask_pad[..., :F]


# ----------------------------------------------------------------------------
# STFT / ISTFT glue (matches torch.stft/istft defaults: center=True, reflect
# pad, periodic Hann window, onesided, normalized=False).
# TODO(synk): FFT itself uses jnp.fft.rfft/irfft in JAX glue (no Pallas FFT).
# ----------------------------------------------------------------------------
def jax_stft(waveform):
    # waveform: (B, L)
    pad = FFT_SIZE // 2
    x = jnp.pad(waveform, ((0, 0), (pad, pad)), mode="reflect")
    n_frames = 1 + (x.shape[1] - FFT_SIZE) // HOP_SIZE
    idx = jnp.arange(n_frames)[:, None] * HOP_SIZE + jnp.arange(FFT_SIZE)[None, :]
    frames = x[:, idx] * WINDOW[None, None, :]              # (B, T, FFT_SIZE)
    spec_c = jnp.fft.rfft(frames, axis=-1)                  # (B, T, F)
    # torch.stft -> (B, F, T, 2); module permutes to (B, T, F, 2): build directly.
    spectrogram = jnp.stack([spec_c.real, spec_c.imag], axis=-1).astype(jnp.float32)
    magnitude = jnp.sqrt(spectrogram[..., 0] ** 2 + spectrogram[..., 1] ** 2)
    return spectrogram, magnitude


def jax_istft(spectrogram, mask):
    # spectrogram: (B, T, F, 2), mask: (B, T, F)
    spec = spectrogram * mask[..., None]
    spec_c = spec[..., 0] + 1j * spec[..., 1]
    frames = jnp.fft.irfft(spec_c, n=FFT_SIZE, axis=-1)     # (B, T, FFT_SIZE)
    frames = frames * WINDOW[None, None, :]
    B, T, _ = frames.shape
    out_len = FFT_SIZE + HOP_SIZE * (T - 1)
    idx = (jnp.arange(T)[:, None] * HOP_SIZE + jnp.arange(FFT_SIZE)[None, :]).reshape(-1)
    y = jnp.zeros((B, out_len), jnp.float32).at[:, idx].add(
        frames.reshape(B, -1).astype(jnp.float32))
    wsum = jnp.zeros((out_len,), jnp.float32).at[idx].add(
        jnp.tile(WINDOW ** 2, T))
    y = y / jnp.where(wsum > 1e-11, wsum, 1.0)[None, :]
    pad = FFT_SIZE // 2
    return y[:, pad: out_len - pad]                          # length = HOP_SIZE*(T-1)


# ----------------------------------------------------------------------------
# Parameters (deterministic, PyTorch-style uniform(-1/sqrt(H), 1/sqrt(H))),
# stored pre-transposed: (in_features, 3H) / (in_features, out), gate order r,z,n.
# ----------------------------------------------------------------------------
def init_params(key, hidden):
    F = N_FREQ
    k = 1.0 / float(hidden) ** 0.5
    keys = jax.random.split(key, 10)

    def u(kk, shape):
        return jax.random.uniform(kk, shape, jnp.float32, -k, k)

    return {
        "wih0": u(keys[0], (F, 3 * hidden)),
        "whh0": u(keys[1], (hidden, 3 * hidden)),
        "bih0": u(keys[2], (1, 3 * hidden)),
        "bhh0": u(keys[3], (1, 3 * hidden)),
        "wih1": u(keys[4], (hidden, 3 * hidden)),
        "whh1": u(keys[5], (hidden, 3 * hidden)),
        "bih1": u(keys[6], (1, 3 * hidden)),
        "bhh1": u(keys[7], (1, 3 * hidden)),
        "wdec": u(keys[8], (hidden, F)),
        "bdec": u(keys[9], (1, F)),
    }


# ----------------------------------------------------------------------------
# Full forward = DenoiserGRU.forward
# ----------------------------------------------------------------------------
def denoiser_gru_forward(waveform, params):
    spectrogram, magnitude = jax_stft(waveform)
    predicted_mask = predict_mask(magnitude, params)         # Pallas kernel
    estimate = jax_istft(spectrogram, predicted_mask)
    return estimate


if __name__ == "__main__":
    key = jax.random.PRNGKey(0)
    k_wave, k_par = jax.random.split(key)

    BATCH, LENGTH, HIDDEN = 2, 128, 32
    waveform = jax.random.normal(k_wave, (BATCH, LENGTH), jnp.float32)
    params = init_params(k_par, HIDDEN)

    fwd = jax.jit(denoiser_gru_forward)
    estimate = fwd(waveform, params)
    jax.block_until_ready(estimate)
    assert estimate.shape == (BATCH, LENGTH), estimate.shape
    print("KERNEL_OK")
</pallas_src>

<mosaic_0001>
module attributes {stable_mosaic.version = 11 : i64} {
  func.func private @main(%arg0: i32) attributes {dimension_semantics = [#tpu.dimension_semantics<core_parallel>], iteration_bounds = array<i64: 2>, tpu.core_type = #tpu.core_type<sc_scalar_subcore>, window_params = []} {
    return
  }
}

module attributes {stable_mosaic.version = 11 : i64} {
  func.func private @main(%arg0: i32) attributes {dimension_semantics = [#tpu.dimension_semantics<core_parallel>], iteration_bounds = array<i64: 2>, tpu.core_type = #tpu.core_type<sc_scalar_subcore>, window_params = []} {
    return
  }
}

module attributes {stable_mosaic.version = 11 : i64} {
  func.func @_gru_decoder_kernel(%arg0: i32, %arg1: memref<1x9x128xbf16, #tpu.memory_space<vmem>>, %arg2: memref<128x128xbf16, #tpu.memory_space<vmem>>, %arg3: memref<32x128xbf16, #tpu.memory_space<vmem>>, %arg4: memref<1x128xf32, #tpu.memory_space<vmem>>, %arg5: memref<32x128xbf16, #tpu.memory_space<vmem>>, %arg6: memref<32x128xbf16, #tpu.memory_space<vmem>>, %arg7: memref<1x128xf32, #tpu.memory_space<vmem>>, %arg8: memref<32x128xbf16, #tpu.memory_space<vmem>>, %arg9: memref<1x128xf32, #tpu.memory_space<vmem>>, %arg10: memref<1x9x128xf32, #tpu.memory_space<vmem>>, %arg11: memref<9x128xf32, #tpu.memory_space<vmem>>, %arg12: memref<9x32xf32, #tpu.memory_space<vmem>>) attributes {dimension_semantics = [#tpu.dimension_semantics<parallel>], iteration_bounds = array<i64: 2>, scalar_prefetch = 0 : i64, scratch_operands = 2 : i64, tpu.core_type = #tpu.core_type<tc>, window_params = [{transform_indices = @transform_0, window_bounds = array<i64: 1, 9, 128>}, {pipeline_mode = #tpu.pipeline_mode<synchronous>, transform_indices = @transform_1, window_bounds = array<i64: 128, 128>}, {pipeline_mode = #tpu.pipeline_mode<synchronous>, transform_indices = @transform_2, window_bounds = array<i64: 32, 128>}, {pipeline_mode = #tpu.pipeline_mode<synchronous>, transform_indices = @transform_3, window_bounds = array<i64: 1, 128>}, {pipeline_mode = #tpu.pipeline_mode<synchronous>, transform_indices = @transform_4, window_bounds = array<i64: 32, 128>}, {pipeline_mode = #tpu.pipeline_mode<synchronous>, transform_indices = @transform_5, window_bounds = array<i64: 32, 128>}, {pipeline_mode = #tpu.pipeline_mode<synchronous>, transform_indices = @transform_6, window_bounds = array<i64: 1, 128>}, {pipeline_mode = #tpu.pipeline_mode<synchronous>, transform_indices = @transform_7, window_bounds = array<i64: 32, 128>}, {pipeline_mode = #tpu.pipeline_mode<synchronous>, transform_indices = @transform_8, window_bounds = array<i64: 1, 128>}, {transform_indices = @transform_9, window_bounds = array<i64: 1, 9, 128>}]} {
    %c0 = arith.constant 0 : index
    %c0_0 = arith.constant 0 : index
    %c0_1 = arith.constant 0 : index
    %0 = vector.load %arg1[%c0, %c0_0, %c0_1] : memref<1x9x128xbf16, #tpu.memory_space<vmem>>, vector<1x9x128xbf16>
    %1 = vector.shape_cast %0 : vector<1x9x128xbf16> to vector<9x128xbf16>
    %c0_2 = arith.constant 0 : index
    %c0_3 = arith.constant 0 : index
    %2 = vector.load %arg2[%c0_2, %c0_3] : memref<128x128xbf16, #tpu.memory_space<vmem>>, vector<128x128xbf16>
    %cst = arith.constant dense<0.000000e+00> : vector<9x128xf32>
    %3 = tpu.matmul %1, %2, %cst {dimension_numbers = #tpu.dot_dimension_numbers<[1], [0], [0], [1], [0, 0, 1, 1], [], []>} : vector<9x128xbf16>, vector<128x128xbf16>, vector<9x128xf32> -> vector<9x128xf32>
    %c0_4 = arith.constant 0 : index
    %c0_5 = arith.constant 0 : index
    %4 = vector.load %arg4[%c0_4, %c0_5] : memref<1x128xf32, #tpu.memory_space<vmem>>, vector<1x128xf32>
    %5 = vector.broadcast %4 : vector<1x128xf32> to vector<9x128xf32>
    %6 = arith.addf %3, %5 : vector<9x128xf32>
    %c0_6 = arith.constant 0 : index
    %c0_7 = arith.constant 0 : index
    %7 = vector.load %arg11[%c0_6, %c0_7] : memref<9x128xf32, #tpu.memory_space<vmem>>, vector<9x128xf32>
    tpu.vector_store %arg11[%c0_6, %c0_7], %6 {strides = array<i32>} : memref<9x128xf32, #tpu.memory_space<vmem>>, vector<9x128xf32>,
    %c0_8 = arith.constant 0 : index
    %c0_9 = arith.constant 0 : index
    %8 = vector.load %arg3[%c0_8, %c0_9] : memref<32x128xbf16, #tpu.memory_space<vmem>>, vector<32x128xbf16>
    %c0_10 = arith.constant 0 : index
    %c0_11 = arith.constant 0 : index
    %9 = vector.load %arg5[%c0_10, %c0_11] : memref<32x128xbf16, #tpu.memory_space<vmem>>, vector<32x128xbf16>
    %c0_12 = arith.constant 0 : index
    %c0_13 = arith.constant 0 : index
    %10 = vector.load %arg6[%c0_12, %c0_13] : memref<32x128xbf16, #tpu.memory_space<vmem>>, vector<32x128xbf16>
    %c0_14 = arith.constant 0 : index
    %c0_15 = arith.constant 0 : index
    %11 = vector.load %arg7[%c0_14, %c0_15] : memref<1x128xf32, #tpu.memory_space<vmem>>, vector<1x128xf32>
    %cst_16 = arith.constant 0.000000e+00 : f32
    %12 = vector.broadcast %cst_16 : f32 to vector<1x32xf32>
    %cst_17 = arith.constant 0.000000e+00 : f32
    %13 = vector.broadcast %cst_17 : f32 to vector<1x32xf32>
    %c0_18 = arith.constant 0 : index
    %c0_19 = arith.constant 0 : index
    %14 = vector.load %arg11[%c0_18, %c0_19] : memref<9x128xf32, #tpu.memory_space<vmem>>, vector<1x128xf32>
    %15 = arith.truncf %12 : vector<1x32xf32> to vector<1x32xbf16>
    %cst_20 = arith.constant dense<0.000000e+00> : vector<1x128xf32>
    %16 = tpu.matmul %15, %8, %cst_20 {dimension_numbers = #tpu.dot_dimension_numbers<[1], [0], [0], [1], [0, 0, 1, 1], [], []>} : vector<1x32xbf16>, vector<32x128xbf16>, vector<1x128xf32> -> vector<1x128xf32>
    %17 = arith.addf %14, %16 : vector<1x128xf32>
    %18 = vector.extract_strided_slice %17 {offsets = [0, 0], sizes = [1, 32], strides = [1, 1]} : vector<1x128xf32> to vector<1x32xf32>
    %19 = arith.negf %18 : vector<1x32xf32>
    %20 = math.exp %19 : vector<1x32xf32>
    %cst_21 = arith.constant 1.000000e+00 : f32
    %21 = vector.broadcast %cst_21 : f32 to vector<1x32xf32>
    %22 = arith.addf %21, %20 : vector<1x32xf32>
    %23 = arith.divf %21, %22 : vector<1x32xf32>
    %24 = vector.extract_strided_slice %17 {offsets = [0, 32], sizes = [1, 32], strides = [1, 1]} : vector<1x128xf32> to vector<1x32xf32>
    %25 = arith.negf %24 : vector<1x32xf32>
    %26 = math.exp %25 : vector<1x32xf32>
    %cst_22 = arith.constant 1.000000e+00 : f32
    %27 = vector.broadcast %cst_22 : f32 to vector<1x32xf32>
    %28 = arith.addf %27, %26 : vector<1x32xf32>
    %29 = arith.divf %27, %28 : vector<1x32xf32>
    %30 = vector.extract_strided_slice %17 {offsets = [0, 64], sizes = [1, 32], strides = [1, 1]} : vector<1x128xf32> to vector<1x32xf32>
    %31 = vector.extract_strided_slice %17 {offsets = [0, 96], sizes = [1, 32], strides = [1, 1]} : vector<1x128xf32> to vector<1x32xf32>
    %32 = arith.mulf %23, %31 : vector<1x32xf32>
    %33 = arith.addf %30, %32 : vector<1x32xf32>
    %34 = math.tanh %33 : vector<1x32xf32>
    %cst_23 = arith.constant 1.000000e+00 : f32
    %35 = vector.broadcast %cst_23 : f32 to vector<1x32xf32>
    %36 = arith.subf %35, %29 : vector<1x32xf32>
    %37 = arith.mulf %36, %34 : vector<1x32xf32>
    %38 = arith.mulf %29, %12 : vector<1x32xf32>
    %39 = arith.addf %37, %38 : vector<1x32xf32>
    %40 = arith.truncf %39 : vector<1x32xf32> to vector<1x32xbf16>
    %cst_24 = arith.constant dense<0.000000e+00> : vector<1x128xf32>
    %41 = tpu.matmul %40, %9, %cst_24 {dimension_numbers = #tpu.dot_dimension_numbers<[1], [0], [0], [1], [0, 0, 1, 1], [], []>} : vector<1x32xbf16>, vector<32x128xbf16>, vector<1x128xf32> -> vector<1x128xf32>
    %42 = arith.truncf %13 : vector<1x32xf32> to vector<1x32xbf16>
    %cst_25 = arith.constant dense<0.000000e+00> : vector<1x128xf32>
    %43 = tpu.matmul %42, %10, %cst_25 {dimension_numbers = #tpu.dot_dimension_numbers<[1], [0], [0], [1], [0, 0, 1, 1], [], []>} : vector<1x32xbf16>, vector<32x128xbf16>, vector<1x128xf32> -> vector<1x128xf32>
    %44 = arith.addf %41, %43 : vector<1x128xf32>
    %45 = arith.addf %44, %11 : vector<1x128xf32>
    %46 = vector.extract_strided_slice %45 {offsets = [0, 0], sizes = [1, 32], strides = [1, 1]} : vector<1x128xf32> to vector<1x32xf32>
    %47 = arith.negf %46 : vector<1x32xf32>
    %48 = math.exp %47 : vector<1x32xf32>
    %cst_26 = arith.constant 1.000000e+00 : f32
    %49 = vector.broadcast %cst_26 : f32 to vector<1x32xf32>
    %50 = arith.addf %49, %48 : vector<1x32xf32>
    %51 = arith.divf %49, %50 : vector<1x32xf32>
    %52 = vector.extract_strided_slice %45 {offsets = [0, 32], sizes = [1, 32], strides = [1, 1]} : vector<1x128xf32> to vector<1x32xf32>
    %53 = arith.negf %52 : vector<1x32xf32>
    %54 = math.exp %53 : vector<1x32xf32>
    %cst_27 = arith.constant 1.000000e+00 : f32
    %55 = vector.broadcast %cst_27 : f32 to vector<1x32xf32>
    %56 = arith.addf %55, %54 : vector<1x32xf32>
    %57 = arith.divf %55, %56 : vector<1x32xf32>
    %58 = vector.extract_strided_slice %45 {offsets = [0, 64], sizes = [1, 32], strides = [1, 1]} : vector<1x128xf32> to vector<1x32xf32>
    %59 = vector.extract_strided_slice %45 {offsets = [0, 96], sizes = [1, 32], strides = [1, 1]} : vector<1x128xf32> to vector<1x32xf32>
    %60 = arith.mulf %51, %59 : vector<1x32xf32>
    %61 = arith.addf %58, %60 : vector<1x32xf32>
    %62 = math.tanh %61 : vector<1x32xf32>
    %cst_28 = arith.constant 1.000000e+00 : f32
    %63 = vector.broadcast %cst_28 : f32 to vector<1x32xf32>
    %64 = arith.subf %63, %57 : vector<1x32xf32>
    %65 = arith.mulf %64, %62 : vector<1x32xf32>
    %66 = arith.mulf %57, %13 : vector<1x32xf32>
    %67 = arith.addf %65, %66 : vector<1x32xf32>
    %c0_29 = arith.constant 0 : index
    %c0_30 = arith.constant 0 : index
    %68 = vector.load %arg12[%c0_29, %c0_30] : memref<9x32xf32, #tpu.memory_space<vmem>>, vector<1x32xf32>
    tpu.vector_store %arg12[%c0_29, %c0_30], %67 {strides = array<i32>} : memref<9x32xf32, #tpu.memory_space<vmem>>, vector<1x32xf32>,
    %c1 = arith.constant 1 : index
    %c0_31 = arith.constant 0 : index
    %69 = vector.load %arg11[%c1, %c0_31] : memref<9x128xf32, #tpu.memory_space<vmem>>, vector<1x128xf32>
    %70 = arith.truncf %39 : vector<1x32xf32> to vector<1x32xbf16>
    %cst_32 = arith.constant dense<0.000000e+00> : vector<1x128xf32>
    %71 = tpu.matmul %70, %8, %cst_32 {dimension_numbers = #tpu.dot_dimension_numbers<[1], [0], [0], [1], [0, 0, 1, 1], [], []>} : vector<1x32xbf16>, vector<32x128xbf16>, vector<1x128xf32> -> vector<1x128xf32>
    %72 = arith.addf %69, %71 : vector<1x128xf32>
    %73 = vector.extract_strided_slice %72 {offsets = [0, 0], sizes = [1, 32], strides = [1, 1]} : vector<1x128xf32> to vector<1x32xf32>
    %74 = arith.negf %73 : vector<1x32xf32>
    %75 = math.exp %74 : vector<1x32xf32>
    %cst_33 = arith.constant 1.000000e+00 : f32
    %76 = vector.broadcast %cst_33 : f32 to vector<1x32xf32>
    %77 = arith.addf %76, %75 : vector<1x32xf32>
    %78 = arith.divf %76, %77 : vector<1x32xf32>
    %79 = vector.extract_strided_slice %72 {offsets = [0, 32], sizes = [1, 32], strides = [1, 1]} : vector<1x128xf32> to vector<1x32xf32>
    %80 = arith.negf %79 : vector<1x32xf32>
    %81 = math.exp %80 : vector<1x32xf32>
    %cst_34 = arith.constant 1.000000e+00 : f32
    %82 = vector.broadcast %cst_34 : f32 to vector<1x32xf32>
    %83 = arith.addf %82, %81 : vector<1x32xf32>
    %84 = arith.divf %82, %83 : vector<1x32xf32>
    %85 = vector.extract_strided_slice %72 {offsets = [0, 64], sizes = [1, 32], strides = [1, 1]} : vector<1x128xf32> to vector<1x32xf32>
    %86 = vector.extract_strided_slice %72 {offsets = [0, 96], sizes = [1, 32], strides = [1, 1]} : vector<1x128xf32> to vector<1x32xf32>
    %87 = arith.mulf %78, %86 : vector<1x32xf32>
    %88 = arith.addf %85, %87 : vector<1x32xf32>
    %89 = math.tanh %88 : vector<1x32xf32>
    %cst_35 = arith.constant 1.000000e+00 : f32
    %90 = vector.broadcast %cst_35 : f32 to vector<1x32xf32>
    %91 = arith.subf %90, %84 : vector<1x32xf32>
    %92 = arith.mulf %91, %89 : vector<1x32xf32>
    %93 = arith.mulf %84, %39 : vector<1x32xf32>
    %94 = arith.addf %92, %93 : vector<1x32xf32>
    %95 = arith.truncf %94 : vector<1x32xf32> to vector<1x32xbf16>
    %cst_36 = arith.constant dense<0.000000e+00> : vector<1x128xf32>
    %96 = tpu.matmul %95, %9, %cst_36 {dimension_numbers = #tpu.dot_dimension_numbers<[1], [0], [0], [1], [0, 0, 1, 1], [], []>} : vector<1x32xbf16>, vector<32x128xbf16>, vector<1x128xf32> -> vector<1x128xf32>
    %97 = arith.truncf %67 : vector<1x32xf32> to vector<1x32xbf16>
    %cst_37 = arith.constant dense<0.000000e+00> : vector<1x128xf32>
    %98 = tpu.matmul %97, %10, %cst_37 {dimension_numbers = #tpu.dot_dimension_numbers<[1], [0], [0], [1], [0, 0, 1, 1], [], []>} : vector<1x32xbf16>, vector<32x128xbf16>, vector<1x128xf32> -> vector<1x128xf32>
    %99 = arith.addf %96, %98 : vector<1x128xf32>
    %100 = arith.addf %99, %11 : vector<1x128xf32>
    %101 = vector.extract_strided_slice %100 {offsets = [0, 0], sizes = [1, 32], strides = [1, 1]} : vector<1x128xf32> to vector<1x32xf32>
    %102 = arith.negf %101 : vector<1x32xf32>
    %103 = math.exp %102 : vector<1x32xf32>
    %cst_38 = arith.constant 1.000000e+00 : f32
    %104 = vector.broadcast %cst_38 : f32 to vector<1x32xf32>
    %105 = arith.addf %104, %103 : vector<1x32xf32>
    %106 = arith.divf %104, %105 : vector<1x32xf32>
    %107 = vector.extract_strided_slice %100 {offsets = [0, 32], sizes = [1, 32], strides = [1, 1]} : vector<1x128xf32> to vector<1x32xf32>
    %108 = arith.negf %107 : vector<1x32xf32>
    %109 = math.exp %108 : vector<1x32xf32>
    %cst_39 = arith.constant 1.000000e+00 : f32
    %110 = vector.broadcast %cst_39 : f32 to vector<1x32xf32>
    %111 = arith.addf %110, %109 : vector<1x32xf32>
    %112 = arith.divf %110, %111 : vector<1x32xf32>
    %113 = vector.extract_strided_slice %100 {offsets = [0, 64], sizes = [1, 32], strides = [1, 1]} : vector<1x128xf32> to vector<1x32xf32>
    %114 = vector.extract_strided_slice %100 {offsets = [0, 96], sizes = [1, 32], strides = [1, 1]} : vector<1x128xf32> to vector<1x32xf32>
    %115 = arith.mulf %106, %114 : vector<1x32xf32>
    %116 = arith.addf %113, %115 : vector<1x32xf32>
    %117 = math.tanh %116 : vector<1x32xf32>
    %cst_40 = arith.constant 1.000000e+00 : f32
    %118 = vector.broadcast %cst_40 : f32 to vector<1x32xf32>
    %119 = arith.subf %118, %112 : vector<1x32xf32>
    %120 = arith.mulf %119, %117 : vector<1x32xf32>
    %121 = arith.mulf %112, %67 : vector<1x32xf32>
    %122 = arith.addf %120, %121 : vector<1x32xf32>
    %c1_41 = arith.constant 1 : index
    %c0_42 = arith.constant 0 : index
    %123 = vector.load %arg12[%c1_41, %c0_42] : memref<9x32xf32, #tpu.memory_space<vmem>>, vector<1x32xf32>
    tpu.vector_store %arg12[%c1_41, %c0_42], %122 {strides = array<i32>} : memref<9x32xf32, #tpu.memory_space<vmem>>, vector<1x32xf32>,
    %c2 = arith.constant 2 : index
    %c0_43 = arith.constant 0 : index
    %124 = vector.load %arg11[%c2, %c0_43] : memref<9x128xf32, #tpu.memory_space<vmem>>, vector<1x128xf32>
    %125 = arith.truncf %94 : vector<1x32xf32> to vector<1x32xbf16>
    %cst_44 = arith.constant dense<0.000000e+00> : vector<1x128xf32>
    %126 = tpu.matmul %125, %8, %cst_44 {dimension_numbers = #tpu.dot_dimension_numbers<[1], [0], [0], [1], [0, 0, 1, 1], [], []>} : vector<1x32xbf16>, vector<32x128xbf16>, vector<1x128xf32> -> vector<1x128xf32>
    %127 = arith.addf %124, %126 : vector<1x128xf32>
    %128 = vector.extract_strided_slice %127 {offsets = [0, 0], sizes = [1, 32], strides = [1, 1]} : vector<1x128xf32> to vector<1x32xf32>
    %129 = arith.negf %128 : vector<1x32xf32>
    %130 = math.exp %129 : vector<1x32xf32>
    %cst_45 = arith.constant 1.000000e+00 : f32
    %131 = vector.broadcast %cst_45 : f32 to vector<1x32xf32>
    %132 = arith.addf %131, %130 : vector<1x32xf32>
    %133 = arith.divf %131, %132 : vector<1x32xf32>
    %134 = vector.extract_strided_slice %127 {offsets = [0, 32], sizes = [1, 32], strides = [1, 1]} : vector<1x128xf32> to vector<1x32xf32>
    %135 = arith.negf %134 : vector<1x32xf32>
    %136 = math.exp %135 : vector<1x32xf32>
    %cst_46 = arith.constant 1.000000e+00 : f32
    %137 = vector.broadcast %cst_46 : f32 to vector<1x32xf32>
    %138 = arith.addf %137, %136 : vector<1x32xf32>
    %139 = arith.divf %137, %138 : vector<1x32xf32>
    %140 = vector.extract_strided_slice %127 {offsets = [0, 64], sizes = [1, 32], strides = [1, 1]} : vector<1x128xf32> to vector<1x32xf32>
    %141 = vector.extract_strided_slice %127 {offsets = [0, 96], sizes = [1, 32], strides = [1, 1]} : vector<1x128xf32> to vector<1x32xf32>
    %142 = arith.mulf %133, %141 : vector<1x32xf32>
    %143 = arith.addf %140, %142 : vector<1x32xf32>
    %144 = math.tanh %143 : vector<1x32xf32>
    %cst_47 = arith.constant 1.000000e+00 : f32
    %145 = vector.broadcast %cst_47 : f32 to vector<1x32xf32>
    %146 = arith.subf %145, %139 : vector<1x32xf32>
    %147 = arith.mulf %146, %144 : vector<1x32xf32>
    %148 = arith.mulf %139, %94 : vector<1x32xf32>
    %149 = arith.addf %147, %148 : vector<1x32xf32>
    %150 = arith.truncf %149 : vector<1x32xf32> to vector<1x32xbf16>
    %cst_48 = arith.constant dense<0.000000e+00> : vector<1x128xf32>
    %151 = tpu.matmul %150, %9, %cst_48 {dimension_numbers = #tpu.dot_dimension_numbers<[1], [0], [0], [1], [0, 0, 1, 1], [], []>} : vector<1x32xbf16>, vector<32x128xbf16>, vector<1x128xf32> -> vector<1x128xf32>
    %152 = arith.truncf %122 : vector<1x32xf32> to vector<1x32xbf16>
    %cst_49 = arith.constant dense<0.000000e+00> : vector<1x128xf32>
    %153 = tpu.matmul %152, %10, %cst_49 {dimension_numbers = #tpu.dot_dimension_numbers<[1], [0], [0], [1], [0, 0, 1, 1], [], []>} : vector<1x32xbf16>, vector<32x128xbf16>, vector<1x128xf32> -> vector<1x128xf32>
    %154 = arith.addf %151, %153 : vector<1x128xf32>
    %155 = arith.addf %154, %11 : vector<1x128xf32>
    %156 = vector.extract_strided_slice %155 {offsets = [0, 0], sizes = [1, 32], strides = [1, 1]} : vector<1x128xf32> to vector<1x32xf32>
    %157 = arith.negf %156 : vector<1x32xf32>
    %158 = math.exp %157 : vector<1x32xf32>
    %cst_50 = arith.constant 1.000000e+00 : f32
    %159 = vector.broadcast %cst_50 : f32 to vector<1x32xf32>
    %160 = arith.addf %159, %158 : vector<1x32xf32>
    %161 = arith.divf %159, %160 : vector<1x32xf32>
    %162 = vector.extract_strided_slice %155 {offsets = [0, 32], sizes = [1, 32], strides = [1, 1]} : vector<1x128xf32> to vector<1x32xf32>
    %163 = arith.negf %162 : vector<1x32xf32>
    %164 = math.exp %163 : vector<1x32xf32>
    %cst_51 = arith.constant 1.000000e+00 : f32
    %165 = vector.broadcast %cst_51 : f32 to vector<1x32xf32>
    %166 = arith.addf %165, %164 : vector<1x32xf32>
    %167 = arith.divf %165, %166 : vector<1x32xf32>
    %168 = vector.extract_strided_slice %155 {offsets = [0, 64], sizes = [1, 32], strides = [1, 1]} : vector<1x128xf32> to vector<1x32xf32>
    %169 = vector.extract_strided_slice %155 {offsets = [0, 96], sizes = [1, 32], strides = [1, 1]} : vector<1x128xf32> to vector<1x32xf32>
    %170 = arith.mulf %161, %169 : vector<1x32xf32>
    %171 = arith.addf %168, %170 : vector<1x32xf32>
    %172 = math.tanh %171 : vector<1x32xf32>
    %cst_52 = arith.constant 1.000000e+00 : f32
    %173 = vector.broadcast %cst_52 : f32 to vector<1x32xf32>
    %174 = arith.subf %173, %167 : vector<1x32xf32>
    %175 = arith.mulf %174, %172 : vector<1x32xf32>
    %176 = arith.mulf %167, %122 : vector<1x32xf32>
    %177 = arith.addf %175, %176 : vector<1x32xf32>
    %c2_53 = arith.constant 2 : index
    %c0_54 = arith.constant 0 : index
    %178 = vector.load %arg12[%c2_53, %c0_54] : memref<9x32xf32, #tpu.memory_space<vmem>>, vector<1x32xf32>
    tpu.vector_store %arg12[%c2_53, %c0_54], %177 {strides = array<i32>} : memref<9x32xf32, #tpu.memory_space<vmem>>, vector<1x32xf32>,
    %c3 = arith.constant 3 : index
    %c0_55 = arith.constant 0 : index
    %179 = vector.load %arg11[%c3, %c0_55] : memref<9x128xf32, #tpu.memory_space<vmem>>, vector<1x128xf32>
    %180 = arith.truncf %149 : vector<1x32xf32> to vector<1x32xbf16>
    %cst_56 = arith.constant dense<0.000000e+00> : vector<1x128xf32>
    %181 = tpu.matmul %180, %8, %cst_56 {dimension_numbers = #tpu.dot_dimension_numbers<[1], [0], [0], [1], [0, 0, 1, 1], [], []>} : vector<1x32xbf16>, vector<32x128xbf16>, vector<1x128xf32> -> vector<1x128xf32>
    %182 = arith.addf %179, %181 : vector<1x128xf32>
    %183 = vector.extract_strided_slice %182 {offsets = [0, 0], sizes = [1, 32], strides = [1, 1]} : vector<1x128xf32> to vector<1x32xf32>
    %184 = arith.negf %183 : vector<1x32xf32>
    %185 = math.exp %184 : vector<1x32xf32>
    %cst_57 = arith.constant 1.000000e+00 : f32
    %186 = vector.broadcast %cst_57 : f32 to vector<1x32xf32>
    %187 = arith.addf %186, %185 : vector<1x32xf32>
    %188 = arith.divf %186, %187 : vector<1x32xf32>
    %189 = vector.extract_strided_slice %182 {offsets = [0, 32], sizes = [1, 32], strides = [1, 1]} : vector<1x128xf32> to vector<1x32xf32>
    %190 = arith.negf %189 : vector<1x32xf32>
    %191 = math.exp %190 : vector<1x32xf32>
    %cst_58 = arith.constant 1.000000e+00 : f32
    %192 = vector.broadcast %cst_58 : f32 to vector<1x32xf32>
    %193 = arith.addf %192, %191 : vector<1x32xf32>
    %194 = arith.divf %192, %193 : vector<1x32xf32>
    %195 = vector.extract_strided_slice %182 {offsets = [0, 64], sizes = [1, 32], strides = [1, 1]} : vector<1x128xf32> to vector<1x32xf32>
    %196 = vector.extract_strided_slice %182 {offsets = [0, 96], sizes = [1, 32], strides = [1, 1]} : vector<1x128xf32> to vector<1x32xf32>
    %197 = arith.mulf %188, %196 : vector<1x32xf32>
    %198 = arith.addf %195, %197 : vector<1x32xf32>
    %199 = math.tanh %198 : vector<1x32xf32>
    %cst_59 = arith.constant 1.000000e+00 : f32
    %200 = vector.broadcast %cst_59 : f32 to vector<1x32xf32>
    %201 = arith.subf %200, %194 : vector<1x32xf32>
    %202 = arith.mulf %201, %199 : vector<1x32xf32>
    %203 = arith.mulf %194, %149 : vector<1x32xf32>
    %204 = arith.addf %202, %203 : vector<1x32xf32>
    %205 = arith.truncf %204 : vector<1x32xf32> to vector<1x32xbf16>
    %cst_60 = arith.constant dense<0.000000e+00> : vector<1x128xf32>
    %206 = tpu.matmul %205, %9, %cst_60 {dimension_numbers = #tpu.dot_dimension_numbers<[1], [0], [0], [1], [0, 0, 1, 1], [], []>} : vector<1x32xbf16>, vector<32x128xbf16>, vector<1x128xf32> -> vector<1x128xf32>
    %207 = arith.truncf %177 : vector<1x32xf32> to vector<1x32xbf16>
    %cst_61 = arith.constant dense<0.000000e+00> : vector<1x128xf32>
    %208 = tpu.matmul %207, %10, %cst_61 {dimension_numbers = #tpu.dot_dimension_numbers<[1], [0], [0], [1], [0, 0, 1, 1], [], []>} : vector<1x32xbf16>, vector<32x128xbf16>, vector<1x128xf32> -> vector<1x128xf32>
    %209 = arith.addf %206, %208 : vector<1x128xf32>
    %210 = arith.addf %209, %11 : vector<1x128xf32>
    %211 = vector.extract_strided_slice %210 {offsets = [0, 0], sizes = [1, 32], strides = [1, 1]} : vector<1x128xf32> to vector<1x32xf32>
    %212 = arith.negf %211 : vector<1x32xf32>
    %213 = math.exp %212 : vector<1x32xf32>
    %cst_62 = arith.constant 1.000000e+00 : f32
    %214 = vector.broadcast %cst_62 : f32 to vector<1x32xf32>
    %215 = arith.addf %214, %213 : vector<1x32xf32>
    %216 = arith.divf %214, %215 : vector<1x32xf32>
    %217 = vector.extract_strided_slice %210 {offsets = [0, 32], sizes = [1, 32], strides = [1, 1]} : vector<1x128xf32> to vector<1x32xf32>
    %218 = arith.negf %217 : vector<1x32xf32>
    %219 = math.exp %218 : vector<1x32xf32>
    %cst_63 = arith.constant 1.000000e+00 : f32
    %220 = vector.broadcast %cst_63 : f32 to vector<1x32xf32>
    %221 = arith.addf %220, %219 : vector<1x32xf32>
    %222 = arith.divf %220, %221 : vector<1x32xf32>
    %223 = vector.extract_strided_slice %210 {offsets = [0, 64], sizes = [1, 32], strides = [1, 1]} : vector<1x128xf32> to vector<1x32xf32>
    %224 = vector.extract_strided_slice %210 {offsets = [0, 96], sizes = [1, 32], strides = [1, 1]} : vector<1x128xf32> to vector<1x32xf32>
    %225 = arith.mulf %216, %224 : vector<1x32xf32>
    %226 = arith.addf %223, %225 : vector<1x32xf32>
    %227 = math.tanh %226 : vector<1x32xf32>
    %cst_64 = arith.constant 1.000000e+00 : f32
    %228 = vector.broadcast %cst_64 : f32 to vector<1x32xf32>
    %229 = arith.subf %228, %222 : vector<1x32xf32>
    %230 = arith.mulf %229, %227 : vector<1x32xf32>
    %231 = arith.mulf %222, %177 : vector<1x32xf32>
    %232 = arith.addf %230, %231 : vector<1x32xf32>
    %c3_65 = arith.constant 3 : index
    %c0_66 = arith.constant 0 : index
    %233 = vector.load %arg12[%c3_65, %c0_66] : memref<9x32xf32, #tpu.memory_space<vmem>>, vector<1x32xf32>
    tpu.vector_store %arg12[%c3_65, %c0_66], %232 {strides = array<i32>} : memref<9x32xf32, #tpu.memory_space<vmem>>, vector<1x32xf32>,
    %c4 = arith.constant 4 : index
    %c0_67 = arith.constant 0 : index
    %234 = vector.load %arg11[%c4, %c0_67] : memref<9x128xf32, #tpu.memory_space<vmem>>, vector<1x128xf32>
    %235 = arith.truncf %204 : vector<1x32xf32> to vector<1x32xbf16>
    %cst_68 = arith.constant dense<0.000000e+00> : vector<1x128xf32>
    %236 = tpu.matmul %235, %8, %cst_68 {dimension_numbers = #tpu.dot_dimension_numbers<[1], [0], [0], [1], [0, 0, 1, 1], [], []>} : vector<1x32xbf16>, vector<32x128xbf16>, vector<1x128xf32> -> vector<1x128xf32>
    %237 = arith.addf %234, %236 : vector<1x128xf32>
    %238 = vector.extract_strided_slice %237 {offsets = [0, 0], sizes = [1, 32], strides = [1, 1]} : vector<1x128xf32> to vector<1x32xf32>
    %239 = arith.negf %238 : vector<1x32xf32>
    %240 = math.exp %239 : vector<1x32xf32>
    %cst_69 = arith.constant 1.000000e+00 : f32
    %241 = vector.broadcast %cst_69 : f32 to vector<1x32xf32>
    %242 = arith.addf %241, %240 : vector<1x32xf32>
    %243 = arith.divf %241, %242 : vector<1x32xf32>
    %244 = vector.extract_strided_slice %237 {offsets = [0, 32], sizes = [1, 32], strides = [1, 1]} : vector<1x128xf32> to vector<1x32xf32>
    %245 = arith.negf %244 : vector<1x32xf32>
    %246 = math.exp %245 : vector<1x32xf32>
    %cst_70 = arith.constant 1.000000e+00 : f32
    %247 = vector.broadcast %cst_70 : f32 to vector<1x32xf32>
    %248 = arith.addf %247, %246 : vector<1x32xf32>
    %249 = arith.divf %247, %248 : vector<1x32xf32>
    %250 = vector.extract_strided_slice %237 {offsets = [0, 64], sizes = [1, 32], strides = [1, 1]} : vector<1x128xf32> to vector<1x32xf32>
    %251 = vector.extract_strided_slice %237 {offsets = [0, 96], sizes = [1, 32], strides = [1, 1]} : vector<1x128xf32> to vector<1x32xf32>
    %252 = arith.mulf %243, %251 : vector<1x32xf32>
    %253 = arith.addf %250, %252 : vector<1x32xf32>
    %254 = math.tanh %253 : vector<1x32xf32>
    %cst_71 = arith.constant 1.000000e+00 : f32
    %255 = vector.broadcast %cst_71 : f32 to vector<1x32xf32>
    %256 = arith.subf %255, %249 : vector<1x32xf32>
    %257 = arith.mulf %256, %254 : vector<1x32xf32>
    %258 = arith.mulf %249, %204 : vector<1x32xf32>
    %259 = arith.addf %257, %258 : vector<1x32xf32>
    %260 = arith.truncf %259 : vector<1x32xf32> to vector<1x32xbf16>
    %cst_72 = arith.constant dense<0.000000e+00> : vector<1x128xf32>
    %261 = tpu.matmul %260, %9, %cst_72 {dimension_numbers = #tpu.dot_dimension_numbers<[1], [0], [0], [1], [0, 0, 1, 1], [], []>} : vector<1x32xbf16>, vector<32x128xbf16>, vector<1x128xf32> -> vector<1x128xf32>
    %262 = arith.truncf %232 : vector<1x32xf32> to vector<1x32xbf16>
    %cst_73 = arith.constant dense<0.000000e+00> : vector<1x128xf32>
    %263 = tpu.matmul %262, %10, %cst_73 {dimension_numbers = #tpu.dot_dimension_numbers<[1], [0], [0], [1], [0, 0, 1, 1], [], []>} : vector<1x32xbf16>, vector<32x128xbf16>, vector<1x128xf32> -> vector<1x128xf32>
    %264 = arith.addf %261, %263 : vector<1x128xf32>
    %265 = arith.addf %264, %11 : vector<1x128xf32>
    %266 = vector.extract_strided_slice %265 {offsets = [0, 0], sizes = [1, 32], strides = [1, 1]} : vector<1x128xf32> to vector<1x32xf32>
    %267 = arith.negf %266 : vector<1x32xf32>
    %268 = math.exp %267 : vector<1x32xf32>
    %cst_74 = arith.constant 1.000000e+00 : f32
    %269 = vector.broadcast %cst_74 : f32 to vector<1x32xf32>
    %270 = arith.addf %269, %268 : vector<1x32xf32>
    %271 = arith.divf %269, %270 : vector<1x32xf32>
    %272 = vector.extract_strided_slice %265 {offsets = [0, 32], sizes = [1, 32], strides = [1, 1]} : vector<1x128xf32> to vector<1x32xf32>
    %273 = arith.negf %272 : vector<1x32xf32>
    %274 = math.exp %273 : vector<1x32xf32>
    %cst_75 = arith.constant 1.000000e+00 : f32
    %275 = vector.broadcast %cst_75 : f32 to vector<1x32xf32>
    %276 = arith.addf %275, %274 : vector<1x32xf32>
    %277 = arith.divf %275, %276 : vector<1x32xf32>
    %278 = vector.extract_strided_slice %265 {offsets = [0, 64], sizes = [1, 32], strides = [1, 1]} : vector<1x128xf32> to vector<1x32xf32>
    %279 = vector.extract_strided_slice %265 {offsets = [0, 96], sizes = [1, 32], strides = [1, 1]} : vector<1x128xf32> to vector<1x32xf32>
    %280 = arith.mulf %271, %279 : vector<1x32xf32>
    %281 = arith.addf %278, %280 : vector<1x32xf32>
    %282 = math.tanh %281 : vector<1x32xf32>
    %cst_76 = arith.constant 1.000000e+00 : f32
    %283 = vector.broadcast %cst_76 : f32 to vector<1x32xf32>
    %284 = arith.subf %283, %277 : vector<1x32xf32>
    %285 = arith.mulf %284, %282 : vector<1x32xf32>
    %286 = arith.mulf %277, %232 : vector<1x32xf32>
    %287 = arith.addf %285, %286 : vector<1x32xf32>
    %c4_77 = arith.constant 4 : index
    %c0_78 = arith.constant 0 : index
    %288 = vector.load %arg12[%c4_77, %c0_78] : memref<9x32xf32, #tpu.memory_space<vmem>>, vector<1x32xf32>
    tpu.vector_store %arg12[%c4_77, %c0_78], %287 {strides = array<i32>} : memref<9x32xf32, #tpu.memory_space<vmem>>, vector<1x32xf32>,
    %c5 = arith.constant 5 : index
    %c0_79 = arith.constant 0 : index
    %289 = vector.load %arg11[%c5, %c0_79] : memref<9x128xf32, #tpu.memory_space<vmem>>, vector<1x128xf32>
    %290 = arith.truncf %259 : vector<1x32xf32> to vector<1x32xbf16>
    %cst_80 = arith.constant dense<0.000000e+00> : vector<1x128xf32>
    %291 = tpu.matmul %290, %8, %cst_80 {dimension_numbers = #tpu.dot_dimension_numbers<[1], [0], [0], [1], [0, 0, 1, 1], [], []>} : vector<1x32xbf16>, vector<32x128xbf16>, vector<1x128xf32> -> vector<1x128xf32>
    %292 = arith.addf %289, %291 : vector<1x128xf32>
    %293 = vector.extract_strided_slice %292 {offsets = [0, 0], sizes = [1, 32], strides = [1, 1]} : vector<1x128xf32> to vector<1x32xf32>
    %294 = arith.negf %293 : vector<1x32xf32>
    %295 = math.exp %294 : vector<1x32xf32>
    %cst_81 = arith.constant 1.000000e+00 : f32
    %296 = vector.broadcast %cst_81 : f32 to vector<1x32xf32>
    %297 = arith.addf %296, %295 : vector<1x32xf32>
    %298 = arith.divf %296, %297 : vector<1x32xf32>
    %299 = vector.extract_strided_slice %292 {offsets = [0, 32], sizes = [1, 32], strides = [1, 1]} : vector<1x128xf32> to vector<1x32xf32>
    %300 = arith.negf %299 : vector<1x32xf32>
    %301 = math.exp %300 : vector<1x32xf32>
    %cst_82 = arith.constant 1.000000e+00 : f32
    %302 = vector.broadcast %cst_82 : f32 to vector<1x32xf32>
    %303 = arith.addf %302, %301 : vector<1x32xf32>
    %304 = arith.divf %302, %303 : vector<1x32xf32>
    %305 = vector.extract_strided_slice %292 {offsets = [0, 64], sizes = [1, 32], strides = [1, 1]} : vector<1x128xf32> to vector<1x32xf32>
    %306 = vector.extract_strided_slice %292 {offsets = [0, 96], sizes = [1, 32], strides = [1, 1]} : vector<1x128xf32> to vector<1x32xf32>
    %307 = arith.mulf %298, %306 : vector<1x32xf32>
    %308 = arith.addf %305, %307 : vector<1x32xf32>
    %309 = math.tanh %308 : vector<1x32xf32>
    %cst_83 = arith.constant 1.000000e+00 : f32
    %310 = vector.broadcast %cst_83 : f32 to vector<1x32xf32>
    %311 = arith.subf %310, %304 : vector<1x32xf32>
    %312 = arith.mulf %311, %309 : vector<1x32xf32>
    %313 = arith.mulf %304, %259 : vector<1x32xf32>
    %314 = arith.addf %312, %313 : vector<1x32xf32>
    %315 = arith.truncf %314 : vector<1x32xf32> to vector<1x32xbf16>
    %cst_84 = arith.constant dense<0.000000e+00> : vector<1x128xf32>
    %316 = tpu.matmul %315, %9, %cst_84 {dimension_numbers = #tpu.dot_dimension_numbers<[1], [0], [0], [1], [0, 0, 1, 1], [], []>} : vector<1x32xbf16>, vector<32x128xbf16>, vector<1x128xf32> -> vector<1x128xf32>
    %317 = arith.truncf %287 : vector<1x32xf32> to vector<1x32xbf16>
    %cst_85 = arith.constant dense<0.000000e+00> : vector<1x128xf32>
    %318 = tpu.matmul %317, %10, %cst_85 {dimension_numbers = #tpu.dot_dimension_numbers<[1], [0], [0], [1], [0, 0, 1, 1], [], []>} : vector<1x32xbf16>, vector<32x128xbf16>, vector<1x128xf32> -> vector<1x128xf32>
    %319 = arith.addf %316, %318 : vector<1x128xf32>
    %320 = arith.addf %319, %11 : vector<1x128xf32>
    %321 = vector.extract_strided_slice %320 {offsets = [0, 0], sizes = [1, 32], strides = [1, 1]} : vector<1x128xf32> to vector<1x32xf32>
    %322 = arith.negf %321 : vector<1x32xf32>
    %323 = math.exp %322 : vector<1x32xf32>
    %cst_86 = arith.constant 1.000000e+00 : f32
    %324 = vector.broadcast %cst_86 : f32 to vector<1x32xf32>
    %325 = arith.addf %324, %323 : vector<1x32xf32>
    %326 = arith.divf %324, %325 : vector<1x32xf32>
    %327 = vector.extract_strided_slice %320 {offsets = [0, 32], sizes = [1, 32], strides = [1, 1]} : vector<1x128xf32> to vector<1x32xf32>
    %328 = arith.negf %327 : vector<1x32xf32>
    %329 = math.exp %328 : vector<1x32xf32>
    %cst_87 = arith.constant 1.000000e+00 : f32
    %330 = vector.broadcast %cst_87 : f32 to vector<1x32xf32>
    %331 = arith.addf %330, %329 : vector<1x32xf32>
    %332 = arith.divf %330, %331 : vector<1x32xf32>
    %333 = vector.extract_strided_slice %320 {offsets = [0, 64], sizes = [1, 32], strides = [1, 1]} : vector<1x128xf32> to vector<1x32xf32>
    %334 = vector.extract_strided_slice %320 {offsets = [0, 96], sizes = [1, 32], strides = [1, 1]} : vector<1x128xf32> to vector<1x32xf32>
    %335 = arith.mulf %326, %334 : vector<1x32xf32>
    %336 = arith.addf %333, %335 : vector<1x32xf32>
    %337 = math.tanh %336 : vector<1x32xf32>
    %cst_88 = arith.constant 1.000000e+00 : f32
    %338 = vector.broadcast %cst_88 : f32 to vector<1x32xf32>
    %339 = arith.subf %338, %332 : vector<1x32xf32>
    %340 = arith.mulf %339, %337 : vector<1x32xf32>
    %341 = arith.mulf %332, %287 : vector<1x32xf32>
    %342 = arith.addf %340, %341 : vector<1x32xf32>
    %c5_89 = arith.constant 5 : index
    %c0_90 = arith.constant 0 : index
    %343 = vector.load %arg12[%c5_89, %c0_90] : memref<9x32xf32, #tpu.memory_space<vmem>>, vector<1x32xf32>
    tpu.vector_store %arg12[%c5_89, %c0_90], %342 {strides = array<i32>} : memref<9x32xf32, #tpu.memory_space<vmem>>, vector<1x32xf32>,
    %c6 = arith.constant 6 : index
    %c0_91 = arith.constant 0 : index
    %344 = vector.load %arg11[%c6, %c0_91] : memref<9x128xf32, #tpu.memory_space<vmem>>, vector<1x128xf32>
    %345 = arith.truncf %314 : vector<1x32xf32> to vector<1x32xbf16>
    %cst_92 = arith.constant dense<0.000000e+00> : vector<1x128xf32>
    %346 = tpu.matmul %345, %8, %cst_92 {dimension_numbers = #tpu.dot_dimension_numbers<[1], [0], [0], [1], [0, 0, 1, 1], [], []>} : vector<1x32xbf16>, vector<32x128xbf16>, vector<1x128xf32> -> vector<1x128xf32>
    %347 = arith.addf %344, %346 : vector<1x128xf32>
    %348 = vector.extract_strided_slice %347 {offsets = [0, 0], sizes = [1, 32], strides = [1, 1]} : vector<1x128xf32> to vector<1x32xf32>
    %349 = arith.negf %348 : vector<1x32xf32>
    %350 = math.exp %349 : vector<1x32xf32>
    %cst_93 = arith.constant 1.000000e+00 : f32
    %351 = vector.broadcast %cst_93 : f32 to vector<1x32xf32>
    %352 = arith.addf %351, %350 : vector<1x32xf32>
    %353 = arith.divf %351, %352 : vector<1x32xf32>
    %354 = vector.extract_strided_slice %347 {offsets = [0, 32], sizes = [1, 32], strides = [1, 1]} : vector<1x128xf32> to vector<1x32xf32>
    %355 = arith.negf %354 : vector<1x32xf32>
    %356 = math.exp %355 : vector<1x32xf32>
    %cst_94 = arith.constant 1.000000e+00 : f32
    %357 = vector.broadcast %cst_94 : f32 to vector<1x32xf32>
    %358 = arith.addf %357, %356 : vector<1x32xf32>
    %359 = arith.divf %357, %358 : vector<1x32xf32>
    %360 = vector.extract_strided_slice %347 {offsets = [0, 64], sizes = [1, 32], strides = [1, 1]} : vector<1x128xf32> to vector<1x32xf32>
    %361 = vector.extract_strided_slice %347 {offsets = [0, 96], sizes = [1, 32], strides = [1, 1]} : vector<1x128xf32> to vector<1x32xf32>
    %362 = arith.mulf %353, %361 : vector<1x32xf32>
    %363 = arith.addf %360, %362 : vector<1x32xf32>
    %364 = math.tanh %363 : vector<1x32xf32>
    %cst_95 = arith.constant 1.000000e+00 : f32
    %365 = vector.broadcast %cst_95 : f32 to vector<1x32xf32>
    %366 = arith.subf %365, %359 : vector<1x32xf32>
    %367 = arith.mulf %366, %364 : vector<1x32xf32>
    %368 = arith.mulf %359, %314 : vector<1x32xf32>
    %369 = arith.addf %367, %368 : vector<1x32xf32>
    %370 = arith.truncf %369 : vector<1x32xf32> to vector<1x32xbf16>
    %cst_96 = arith.constant dense<0.000000e+00> : vector<1x128xf32>
    %371 = tpu.matmul %370, %9, %cst_96 {dimension_numbers = #tpu.dot_dimension_numbers<[1], [0], [0], [1], [0, 0, 1, 1], [], []>} : vector<1x32xbf16>, vector<32x128xbf16>, vector<1x128xf32> -> vector<1x128xf32>
    %372 = arith.truncf %342 : vector<1x32xf32> to vector<1x32xbf16>
    %cst_97 = arith.constant dense<0.000000e+00> : vector<1x128xf32>
    %373 = tpu.matmul %372, %10, %cst_97 {dimension_numbers = #tpu.dot_dimension_numbers<[1], [0], [0], [1], [0, 0, 1, 1], [], []>} : vector<1x32xbf16>, vector<32x128xbf16>, vector<1x128xf32> -> vector<1x128xf32>
    %374 = arith.addf %371, %373 : vector<1x128xf32>
    %375 = arith.addf %374, %11 : vector<1x128xf32>
    %376 = vector.extract_strided_slice %375 {offsets = [0, 0], sizes = [1, 32], strides = [1, 1]} : vector<1x128xf32> to vector<1x32xf32>
    %377 = arith.negf %376 : vector<1x32xf32>
    %378 = math.exp %377 : vector<1x32xf32>
    %cst_98 = arith.constant 1.000000e+00 : f32
    %379 = vector.broadcast %cst_98 : f32 to vector<1x32xf32>
    %380 = arith.addf %379, %378 : vector<1x32xf32>
    %381 = arith.divf %379, %380 : vector<1x32xf32>
    %382 = vector.extract_strided_slice %375 {offsets = [0, 32], sizes = [1, 32], strides = [1, 1]} : vector<1x128xf32> to vector<1x32xf32>
    %383 = arith.negf %382 : vector<1x32xf32>
    %384 = math.exp %383 : vector<1x32xf32>
    %cst_99 = arith.constant 1.000000e+00 : f32
    %385 = vector.broadcast %cst_99 : f32 to vector<1x32xf32>
    %386 = arith.addf %385, %384 : vector<1x32xf32>
    %387 = arith.divf %385, %386 : vector<1x32xf32>
    %388 = vector.extract_strided_slice %375 {offsets = [0, 64], sizes = [1, 32], strides = [1, 1]} : vector<1x128xf32> to vector<1x32xf32>
    %389 = vector.extract_strided_slice %375 {offsets = [0, 96], sizes = [1, 32], strides = [1, 1]} : vector<1x128xf32> to vector<1x32xf32>
    %390 = arith.mulf %381, %389 : vector<1x32xf32>
    %391 = arith.addf %388, %390 : vector<1x32xf32>
    %392 = math.tanh %391 : vector<1x32xf32>
    %cst_100 = arith.constant 1.000000e+00 : f32
    %393 = vector.broadcast %cst_100 : f32 to vector<1x32xf32>
    %394 = arith.subf %393, %387 : vector<1x32xf32>
    %395 = arith.mulf %394, %392 : vector<1x32xf32>
    %396 = arith.mulf %387, %342 : vector<1x32xf32>
    %397 = arith.addf %395, %396 : vector<1x32xf32>
    %c6_101 = arith.constant 6 : index
    %c0_102 = arith.constant 0 : index
    %398 = vector.load %arg12[%c6_101, %c0_102] : memref<9x32xf32, #tpu.memory_space<vmem>>, vector<1x32xf32>
    tpu.vector_store %arg12[%c6_101, %c0_102], %397 {strides = array<i32>} : memref<9x32xf32, #tpu.memory_space<vmem>>, vector<1x32xf32>,
    %c7 = arith.constant 7 : index
    %c0_103 = arith.constant 0 : index
    %399 = vector.load %arg11[%c7, %c0_103] : memref<9x128xf32, #tpu.memory_space<vmem>>, vector<1x128xf32>
    %400 = arith.truncf %369 : vector<1x32xf32> to vector<1x32xbf16>
    %cst_104 = arith.constant dense<0.000000e+00> : vector<1x128xf32>
    %401 = tpu.matmul %400, %8, %cst_104 {dimension_numbers = #tpu.dot_dimension_numbers<[1], [0], [0], [1], [0, 0, 1, 1], [], []>} : vector<1x32xbf16>, vector<32x128xbf16>, vector<1x128xf32> -> vector<1x128xf32>
    %402 = arith.addf %399, %401 : vector<1x128xf32>
    %403 = vector.extract_strided_slice %402 {offsets = [0, 0], sizes = [1, 32], strides = [1, 1]} : vector<1x128xf32> to vector<1x32xf32>
    %404 = arith.negf %403 : vector<1x32xf32>
    %405 = math.exp %404 : vector<1x32xf32>
    %cst_105 = arith.constant 1.000000e+00 : f32
    %406 = vector.broadcast %cst_105 : f32 to vector<1x32xf32>
    %407 = arith.addf %406, %405 : vector<1x32xf32>
    %408 = arith.divf %406, %407 : vector<1x32xf32>
    %409 = vector.extract_strided_slice %402 {offsets = [0, 32], sizes = [1, 32], strides = [1, 1]} : vector<1x128xf32> to vector<1x32xf32>
    %410 = arith.negf %409 : vector<1x32xf32>
    %411 = math.exp %410 : vector<1x32xf32>
    %cst_106 = arith.constant 1.000000e+00 : f32
    %412 = vector.broadcast %cst_106 : f32 to vector<1x32xf32>
    %413 = arith.addf %412, %411 : vector<1x32xf32>
    %414 = arith.divf %412, %413 : vector<1x32xf32>
    %415 = vector.extract_strided_slice %402 {offsets = [0, 64], sizes = [1, 32], strides = [1, 1]} : vector<1x128xf32> to vector<1x32xf32>
    %416 = vector.extract_strided_slice %402 {offsets = [0, 96], sizes = [1, 32], strides = [1, 1]} : vector<1x128xf32> to vector<1x32xf32>
    %417 = arith.mulf %408, %416 : vector<1x32xf32>
    %418 = arith.addf %415, %417 : vector<1x32xf32>
    %419 = math.tanh %418 : vector<1x32xf32>
    %cst_107 = arith.constant 1.000000e+00 : f32
    %420 = vector.broadcast %cst_107 : f32 to vector<1x32xf32>
    %421 = arith.subf %420, %414 : vector<1x32xf32>
    %422 = arith.mulf %421, %419 : vector<1x32xf32>
    %423 = arith.mulf %414, %369 : vector<1x32xf32>
    %424 = arith.addf %422, %423 : vector<1x32xf32>
    %425 = arith.truncf %424 : vector<1x32xf32> to vector<1x32xbf16>
    %cst_108 = arith.constant dense<0.000000e+00> : vector<1x128xf32>
    %426 = tpu.matmul %425, %9, %cst_108 {dimension_numbers = #tpu.dot_dimension_numbers<[1], [0], [0], [1], [0, 0, 1, 1], [], []>} : vector<1x32xbf16>, vector<32x128xbf16>, vector<1x128xf32> -> vector<1x128xf32>
    %427 = arith.truncf %397 : vector<1x32xf32> to vector<1x32xbf16>
    %cst_109 = arith.constant dense<0.000000e+00> : vector<1x128xf32>
    %428 = tpu.matmul %427, %10, %cst_109 {dimension_numbers = #tpu.dot_dimension_numbers<[1], [0], [0], [1], [0, 0, 1, 1], [], []>} : vector<1x32xbf16>, vector<32x128xbf16>, vector<1x128xf32> -> vector<1x128xf32>
    %429 = arith.addf %426, %428 : vector<1x128xf32>
    %430 = arith.addf %429, %11 : vector<1x128xf32>
    %431 = vector.extract_strided_slice %430 {offsets = [0, 0], sizes = [1, 32], strides = [1, 1]} : vector<1x128xf32> to vector<1x32xf32>
    %432 = arith.negf %431 : vector<1x32xf32>
    %433 = math.exp %432 : vector<1x32xf32>
    %cst_110 = arith.constant 1.000000e+00 : f32
    %434 = vector.broadcast %cst_110 : f32 to vector<1x32xf32>
    %435 = arith.addf %434, %433 : vector<1x32xf32>
    %436 = arith.divf %434, %435 : vector<1x32xf32>
    %437 = vector.extract_strided_slice %430 {offsets = [0, 32], sizes = [1, 32], strides = [1, 1]} : vector<1x128xf32> to vector<1x32xf32>
    %438 = arith.negf %437 : vector<1x32xf32>
    %439 = math.exp %438 : vector<1x32xf32>
    %cst_111 = arith.constant 1.000000e+00 : f32
    %440 = vector.broadcast %cst_111 : f32 to vector<1x32xf32>
    %441 = arith.addf %440, %439 : vector<1x32xf32>
    %442 = arith.divf %440, %441 : vector<1x32xf32>
    %443 = vector.extract_strided_slice %430 {offsets = [0, 64], sizes = [1, 32], strides = [1, 1]} : vector<1x128xf32> to vector<1x32xf32>
    %444 = vector.extract_strided_slice %430 {offsets = [0, 96], sizes = [1, 32], strides = [1, 1]} : vector<1x128xf32> to vector<1x32xf32>
    %445 = arith.mulf %436, %444 : vector<1x32xf32>
    %446 = arith.addf %443, %445 : vector<1x32xf32>
    %447 = math.tanh %446 : vector<1x32xf32>
    %cst_112 = arith.constant 1.000000e+00 : f32
    %448 = vector.broadcast %cst_112 : f32 to vector<1x32xf32>
    %449 = arith.subf %448, %442 : vector<1x32xf32>
    %450 = arith.mulf %449, %447 : vector<1x32xf32>
    %451 = arith.mulf %442, %397 : vector<1x32xf32>
    %452 = arith.addf %450, %451 : vector<1x32xf32>
    %c7_113 = arith.constant 7 : index
    %c0_114 = arith.constant 0 : index
    %453 = vector.load %arg12[%c7_113, %c0_114] : memref<9x32xf32, #tpu.memory_space<vmem>>, vector<1x32xf32>
    tpu.vector_store %arg12[%c7_113, %c0_114], %452 {strides = array<i32>} : memref<9x32xf32, #tpu.memory_space<vmem>>, vector<1x32xf32>,
    %c8 = arith.constant 8 : index
    %c0_115 = arith.constant 0 : index
    %454 = vector.load %arg11[%c8, %c0_115] : memref<9x128xf32, #tpu.memory_space<vmem>>, vector<1x128xf32>
    %455 = arith.truncf %424 : vector<1x32xf32> to vector<1x32xbf16>
    %cst_116 = arith.constant dense<0.000000e+00> : vector<1x128xf32>
    %456 = tpu.matmul %455, %8, %cst_116 {dimension_numbers = #tpu.dot_dimension_numbers<[1], [0], [0], [1], [0, 0, 1, 1], [], []>} : vector<1x32xbf16>, vector<32x128xbf16>, vector<1x128xf32> -> vector<1x128xf32>
    %457 = arith.addf %454, %456 : vector<1x128xf32>
    %458 = vector.extract_strided_slice %457 {offsets = [0, 0], sizes = [1, 32], strides = [1, 1]} : vector<1x128xf32> to vector<1x32xf32>
    %459 = arith.negf %458 : vector<1x32xf32>
    %460 = math.exp %459 : vector<1x32xf32>
    %cst_117 = arith.constant 1.000000e+00 : f32
    %461 = vector.broadcast %cst_117 : f32 to vector<1x32xf32>
    %462 = arith.addf %461, %460 : vector<1x32xf32>
    %463 = arith.divf %461, %462 : vector<1x32xf32>
    %464 = vector.extract_strided_slice %457 {offsets = [0, 32], sizes = [1, 32], strides = [1, 1]} : vector<1x128xf32> to vector<1x32xf32>
    %465 = arith.negf %464 : vector<1x32xf32>
    %466 = math.exp %465 : vector<1x32xf32>
    %cst_118 = arith.constant 1.000000e+00 : f32
    %467 = vector.broadcast %cst_118 : f32 to vector<1x32xf32>
    %468 = arith.addf %467, %466 : vector<1x32xf32>
    %469 = arith.divf %467, %468 : vector<1x32xf32>
    %470 = vector.extract_strided_slice %457 {offsets = [0, 64], sizes = [1, 32], strides = [1, 1]} : vector<1x128xf32> to vector<1x32xf32>
    %471 = vector.extract_strided_slice %457 {offsets = [0, 96], sizes = [1, 32], strides = [1, 1]} : vector<1x128xf32> to vector<1x32xf32>
    %472 = arith.mulf %463, %471 : vector<1x32xf32>
    %473 = arith.addf %470, %472 : vector<1x32xf32>
    %474 = math.tanh %473 : vector<1x32xf32>
    %cst_119 = arith.constant 1.000000e+00 : f32
    %475 = vector.broadcast %cst_119 : f32 to vector<1x32xf32>
    %476 = arith.subf %475, %469 : vector<1x32xf32>
    %477 = arith.mulf %476, %474 : vector<1x32xf32>
    %478 = arith.mulf %469, %424 : vector<1x32xf32>
    %479 = arith.addf %477, %478 : vector<1x32xf32>
    %480 = arith.truncf %479 : vector<1x32xf32> to vector<1x32xbf16>
    %cst_120 = arith.constant dense<0.000000e+00> : vector<1x128xf32>
    %481 = tpu.matmul %480, %9, %cst_120 {dimension_numbers = #tpu.dot_dimension_numbers<[1], [0], [0], [1], [0, 0, 1, 1], [], []>} : vector<1x32xbf16>, vector<32x128xbf16>, vector<1x128xf32> -> vector<1x128xf32>
    %482 = arith.truncf %452 : vector<1x32xf32> to vector<1x32xbf16>
    %cst_121 = arith.constant dense<0.000000e+00> : vector<1x128xf32>
    %483 = tpu.matmul %482, %10, %cst_121 {dimension_numbers = #tpu.dot_dimension_numbers<[1], [0], [0], [1], [0, 0, 1, 1], [], []>} : vector<1x32xbf16>, vector<32x128xbf16>, vector<1x128xf32> -> vector<1x128xf32>
    %484 = arith.addf %481, %483 : vector<1x128xf32>
    %485 = arith.addf %484, %11 : vector<1x128xf32>
    %486 = vector.extract_strided_slice %485 {offsets = [0, 0], sizes = [1, 32], strides = [1, 1]} : vector<1x128xf32> to vector<1x32xf32>
    %487 = arith.negf %486 : vector<1x32xf32>
    %488 = math.exp %487 : vector<1x32xf32>
    %cst_122 = arith.constant 1.000000e+00 : f32
    %489 = vector.broadcast %cst_122 : f32 to vector<1x32xf32>
    %490 = arith.addf %489, %488 : vector<1x32xf32>
    %491 = arith.divf %489, %490 : vector<1x32xf32>
    %492 = vector.extract_strided_slice %485 {offsets = [0, 32], sizes = [1, 32], strides = [1, 1]} : vector<1x128xf32> to vector<1x32xf32>
    %493 = arith.negf %492 : vector<1x32xf32>
    %494 = math.exp %493 : vector<1x32xf32>
    %cst_123 = arith.constant 1.000000e+00 : f32
    %495 = vector.broadcast %cst_123 : f32 to vector<1x32xf32>
    %496 = arith.addf %495, %494 : vector<1x32xf32>
    %497 = arith.divf %495, %496 : vector<1x32xf32>
    %498 = vector.extract_strided_slice %485 {offsets = [0, 64], sizes = [1, 32], strides = [1, 1]} : vector<1x128xf32> to vector<1x32xf32>
    %499 = vector.extract_strided_slice %485 {offsets = [0, 96], sizes = [1, 32], strides = [1, 1]} : vector<1x128xf32> to vector<1x32xf32>
    %500 = arith.mulf %491, %499 : vector<1x32xf32>
    %501 = arith.addf %498, %500 : vector<1x32xf32>
    %502 = math.tanh %501 : vector<1x32xf32>
    %cst_124 = arith.constant 1.000000e+00 : f32
    %503 = vector.broadcast %cst_124 : f32 to vector<1x32xf32>
    %504 = arith.subf %503, %497 : vector<1x32xf32>
    %505 = arith.mulf %504, %502 : vector<1x32xf32>
    %506 = arith.mulf %497, %452 : vector<1x32xf32>
    %507 = arith.addf %505, %506 : vector<1x32xf32>
    %c8_125 = arith.constant 8 : index
    %c0_126 = arith.constant 0 : index
    %508 = vector.load %arg12[%c8_125, %c0_126] : memref<9x32xf32, #tpu.memory_space<vmem>>, vector<1x32xf32>
    tpu.vector_store %arg12[%c8_125, %c0_126], %507 {strides = array<i32>} : memref<9x32xf32, #tpu.memory_space<vmem>>, vector<1x32xf32>,
    %c0_127 = arith.constant 0 : index
    %c0_128 = arith.constant 0 : index
    %509 = vector.load %arg12[%c0_127, %c0_128] : memref<9x32xf32, #tpu.memory_space<vmem>>, vector<9x32xf32>
    %510 = arith.truncf %509 : vector<9x32xf32> to vector<9x32xbf16>
    %c0_129 = arith.constant 0 : index
    %c0_130 = arith.constant 0 : index
    %511 = vector.load %arg8[%c0_129, %c0_130] : memref<32x128xbf16, #tpu.memory_space<vmem>>, vector<32x128xbf16>
    %cst_131 = arith.constant dense<0.000000e+00> : vector<9x128xf32>
    %512 = tpu.matmul %510, %511, %cst_131 {dimension_numbers = #tpu.dot_dimension_numbers<[1], [0], [0], [1], [0, 0, 1, 1], [], []>} : vector<9x32xbf16>, vector<32x128xbf16>, vector<9x128xf32> -> vector<9x128xf32>
    %c0_132 = arith.constant 0 : index
    %c0_133 = arith.constant 0 : index
    %513 = vector.load %arg9[%c0_132, %c0_133] : memref<1x128xf32, #tpu.memory_space<vmem>>, vector<1x128xf32>
    %514 = vector.broadcast %513 : vector<1x128xf32> to vector<9x128xf32>
    %515 = arith.addf %512, %514 : vector<9x128xf32>
    %516 = arith.negf %515 : vector<9x128xf32>
    %517 = math.exp %516 : vector<9x128xf32>
    %cst_134 = arith.constant 1.000000e+00 : f32
    %518 = vector.broadcast %cst_134 : f32 to vector<9x128xf32>
    %519 = arith.addf %518, %517 : vector<9x128xf32>
    %520 = arith.divf %518, %519 : vector<9x128xf32>
    %c0_135 = arith.constant 0 : index
    %c0_136 = arith.constant 0 : index
    %c0_137 = arith.constant 0 : index
    %521 = vector.load %arg10[%c0_135, %c0_136, %c0_137] : memref<1x9x128xf32, #tpu.memory_space<vmem>>, vector<1x9x128xf32>
    %522 = vector.shape_cast %521 : vector<1x9x128xf32> to vector<9x128xf32>
    %523 = vector.shape_cast %520 : vector<9x128xf32> to vector<1x9x128xf32>
    tpu.vector_store %arg10[%c0_135, %c0_136, %c0_137], %523 {strides = array<i32>} : memref<1x9x128xf32, #tpu.memory_space<vmem>>, vector<1x9x128xf32>,
    return
  }
  func.func @transform_0(%arg0: i32) -> (i32, i32, i32) {
    %c0_i32 = arith.constant 0 : i32
    %c0_i32_0 = arith.constant 0 : i32
    %c0_i32_1 = arith.constant 0 : i32
    return %arg0, %c0_i32, %c0_i32_0 : i32, i32, i32
  }
  func.func @transform_1(%arg0: i32) -> (i32, i32) {
    %c0_i32 = arith.constant 0 : i32
    %c0_i32_0 = arith.constant 0 : i32
    %c0_i32_1 = arith.constant 0 : i32
    return %c0_i32, %c0_i32_0 : i32, i32
  }
  func.func @transform_2(%arg0: i32) -> (i32, i32) {
    %c0_i32 = arith.constant 0 : i32
    %c0_i32_0 = arith.constant 0 : i32
    %c0_i32_1 = arith.constant 0 : i32
    return %c0_i32, %c0_i32_0 : i32, i32
  }
  func.func @transform_3(%arg0: i32) -> (i32, i32) {
    %c0_i32 = arith.constant 0 : i32
    %c0_i32_0 = arith.constant 0 : i32
    %c0_i32_1 = arith.constant 0 : i32
    return %c0_i32, %c0_i32_0 : i32, i32
  }
  func.func @transform_4(%arg0: i32) -> (i32, i32) {
    %c0_i32 = arith.constant 0 : i32
    %c0_i32_0 = arith.constant 0 : i32
    %c0_i32_1 = arith.constant 0 : i32
    return %c0_i32, %c0_i32_0 : i32, i32
  }
  func.func @transform_5(%arg0: i32) -> (i32, i32) {
    %c0_i32 = arith.constant 0 : i32
    %c0_i32_0 = arith.constant 0 : i32
    %c0_i32_1 = arith.constant 0 : i32
    return %c0_i32, %c0_i32_0 : i32, i32
  }
  func.func @transform_6(%arg0: i32) -> (i32, i32) {
    %c0_i32 = arith.constant 0 : i32
    %c0_i32_0 = arith.constant 0 : i32
    %c0_i32_1 = arith.constant 0 : i32
    return %c0_i32, %c0_i32_0 : i32, i32
  }
  func.func @transform_7(%arg0: i32) -> (i32, i32) {
    %c0_i32 = arith.constant 0 : i32
    %c0_i32_0 = arith.constant 0 : i32
    %c0_i32_1 = arith.constant 0 : i32
    return %c0_i32, %c0_i32_0 : i32, i32
  }
  func.func @transform_8(%arg0: i32) -> (i32, i32) {
    %c0_i32 = arith.constant 0 : i32
    %c0_i32_0 = arith.constant 0 : i32
    %c0_i32_1 = arith.constant 0 : i32
    return %c0_i32, %c0_i32_0 : i32, i32
  }
  func.func @transform_9(%arg0: i32) -> (i32, i32, i32) {
    %c0_i32 = arith.constant 0 : i32
    %c0_i32_0 = arith.constant 0 : i32
    %c0_i32_1 = arith.constant 0 : i32
    return %arg0, %c0_i32, %c0_i32_0 : i32, i32, i32
  }
}

</mosaic_0001>

<bundles_post_ra>
// kernel: reverse.0
= control target key start
LH: loop header
LB: loop body
LE: loop exit
PB: predicated region body
PF: predicated region fallthrough
CT: control target
= control target key end

     0   :  { %v2_v0 = vlaneseq  ;;  %s160_s0 = inlined_call_operand.vmem [shape: f32[2,9,15], index: 0, kind: input, shape index: {}]   ;;  %s161_s1 = inlined_call_operand.vmem [shape: f32[2,9,15], index: 1, kind: output, shape index: {}]  }
   0x1   :  { %v42_v2 = vld [vmem:[%s160_s0 + $0x10] sm:$0xff]  ;;  %v38_v3 = vld [vmem:[%s160_s0] sm:$0xff]  ;;  %v44_v4 = vld [vmem:[%s160_s0 + $0x18] sm:$0xff] }
   0x2   :  { %v3_v1 = vsub.s32 14, %v2_v0  ;;  %v40_v5 = vld [vmem:[%s160_s0 + $0x8] sm:$0xff] }
   0x4   :  { %4 = vset.pattern.permute.xlu0 %v3_v1  ;;  %125 = vset.pattern.permute.xlu1 %v3_v1 }
   0x5   :  { %62 = vperm.xlu1 %125, %v42_v2   ;;  %50 = vperm.xlu0 %4, %v38_v3  }
   0x9   :  { %68 = vperm.xlu1 %125, %v44_v4   ;;  %56 = vperm.xlu0 %4, %v40_v5  }
  0x84   :  { %v63_v6 = vpop.permute.xlu1 %62  ;;  %v51_v7 = vpop.permute.xlu0 %50 }
  0x85   :  { %109 = vst [vmem:[%s161_s1 + $0x10] sm:$0xff] %v63_v6  ;;  %105 = vst [vmem:[%s161_s1] sm:$0xff] %v51_v7 }
  0x88   :  { %v69_v8 = vpop.permute.xlu1 %68  ;;  %v57_v9 = vpop.permute.xlu0 %56 }
  0x89   :  { %111 = vst [vmem:[%s161_s1 + $0x18] sm:$0xff] %v69_v8  ;;  %107 = vst [vmem:[%s161_s1 + $0x8] sm:$0xff] %v57_v9 }

// kernel: tile.6
= control target key start
LH: loop header
LB: loop body
LE: loop exit
PB: predicated region body
PF: predicated region fallthrough
CT: control target
= control target key end

     0   :  { %s28_s0 = inlined_call_operand.vmem [shape: f32[32], index: 0, kind: input, shape index: {}]   ;;  %s29_s1 = inlined_call_operand.vmem [shape: f32[9,32], index: 1, kind: output, shape index: {}]  }
   0x1   :  { %v4_v0 = vld [vmem:[%s28_s0] ss:$0 sm:$0xff] }
   0x2   :  { %5 = vst [vmem:[%s29_s1] sm:$0xff] %v4_v0  ;;  %8 = vst [vmem:[%s29_s1 + $0x8] sm:$0xff] %v4_v0 }

// kernel: denoiser_gru_forward.1
= control target key start
LH: loop header
LB: loop body
LE: loop exit
PB: predicated region body
PF: predicated region fallthrough
CT: control target
= control target key end

     0   :  { %s3003_s30 = smov 0   ;;  %s3503_s0 = inlined_call_operand.vmem [shape: bf16[2,9,128], index: 0, kind: input, shape index: {}]   ;;  %s3504_s1 = inlined_call_operand.vmem [shape: bf16[128,128], index: 1, kind: input, shape index: {}]   ;;  %s3505_s2 = inlined_call_operand.vmem [shape: bf16[32,128], index: 2, kind: input, shape index: {}]   ;;  %s3506_s3 = inlined_call_operand.vmem [shape: f32[1,128], index: 3, kind: input, shape index: {}]   ;;  %s3507_s4 = inlined_call_operand.vmem [shape: bf16[32,128], index: 4, kind: input, shape index: {}]   ;;  %s3508_s5 = inlined_call_operand.vmem [shape: bf16[32,128], index: 5, kind: input, shape index: {}]   ;;  %s3509_s6 = inlined_call_operand.vmem [shape: f32[1,128], index: 6, kind: input, shape index: {}]   ;;  %s3510_s7 = inlined_call_operand.vmem [shape: bf16[32,128], index: 7, kind: input, shape index: {}]   ;;  %s3511_s8 = inlined_call_operand.vmem [shape: f32[1,128], index: 8, kind: input, shape index: {}]   ;;  %s3512_s9 = inlined_call_operand.vmem [shape: f32[2,9,128], index: 9, kind: output, shape index: {}]  }
   0x1 LB: > { %s2370_s10 = sadd.s32 4294967295, %s2945_s30   ;;  %p2374_p0 = scmp.ge.s32.totalorder %s2945_s30, 1  ;;  %s2945_s30 = sphi %s3003_s30, %s19_s30  }
   0x2   : > { %p287_p1 = scmp.lt.s32.totalorder %s2945_s30, 3 }
   0x4   : > { %p288_p2 = pnand %p2374_p0, %p287_p1 }
   0x5   : > { %v2799_v0 = vld [vmem:[%s3504_s1] sm:$0xff] (!%p288_p2)   ;;  %v2947_v1 = vmov (!%p288_p2), 0.0   ;;  %v2800_v2 = vld [vmem:[%s3504_s1 + $0x8] sm:$0xff] (!%p288_p2)   ;;  %vm2948_vm0 = vmmov (!%p288_p2), 0   ;;  %p323_p3 = scmp.lt.s32.totalorder (!%p288_p2), %s2370_s10, 1  ;;  %v2801_v3 = vld [vmem:[%s3504_s1 + $0x10] sm:$0xff] (!%p288_p2)  }
   0x6   : > { %291 = sbr.rel (%p288_p2) target bundleno = 7292 (0x1c7c), region = 56  ;;  %2541 = vmatprep.subr.bf16.mxu0 (!%p288_p2), %v2947_v1  ;;  %2561 = vmatprep.subr.bf16.mxu1 (!%p288_p2), %v2947_v1  ;;  %v3037_v4 = vld [vmem:[%s3505_s2] sm:$0xff] (!%p288_p2)   ;;  %v2802_v5 = vld [vmem:[%s3504_s1 + $0x18] sm:$0xff] (!%p288_p2)   ;;  %v3047_v6 = vld [vmem:[%s3505_s2 + $0x8] sm:$0xff] (!%p288_p2)   ;;  %v2949_v9 = vmov (!%p288_p2), 0   ;;  %s2950_s18 = smov (!%p288_p2), 32  }
   0x7   : > { %2542 = vmatpush3.bf16.msra.mxu0 (!%p288_p2), %v2799_v0  ;;  %2557 = vmatprep.mubr.msk.bf16.mxu0 (!%p288_p2), %vm2948_vm0, %v2947_v1  ;;  %v2803_v7 = vld [vmem:[%s3504_s1 + $0x20] sm:$0xff] (!%p288_p2)   ;;  %v2804_v8 = vld [vmem:[%s3504_s1 + $0x28] sm:$0xff] (!%p288_p2)   ;;  %v2805_v10 = vld [vmem:[%s3504_s1 + $0x30] sm:$0xff] (!%p288_p2)   ;;  %s2951_s19 = smov (!%p288_p2), 64   ;;  %s2952_s26 = smov (!%p288_p2), 96   ;;  %vm482_vm1 = vcmask (!%p288_p2), 261120  }
   0x8   : > { %2543 = vmatprep.subr.bf16.mxu0 (!%p288_p2), %v2947_v1  ;;  %2565 = vmatprep.mubr.msk.bf16.mxu1 (!%p288_p2), %vm2948_vm0, %v2947_v1  ;;  %v2806_v11 = vld [vmem:[%s3504_s1 + $0x38] sm:$0xff] (!%p288_p2)   ;;  %v2379_v17 = vld [vmem:[%s3506_s3] ss:$0 sm:$0xff] (!%p288_p2)  ;;  %v3087_v35 = vld [vmem:[%s3508_s5 + $0x8] sm:$0xff] (!%p288_p2)   ;;  %vm693_vm2 = vcmask (!%p288_p2), 253952  }
   0x9   : > { %2562 = vmatpush3.bf16.msra.mxu1 (!%p288_p2), %v3037_v4  ;;  %v3081_v34 = vld [vmem:[%s3508_s5] sm:$0xff] (!%p288_p2)   ;;  %v3106_v38 = vld [vmem:[%s3507_s4 + $0x8] sm:$0xff] (!%p288_p2)  }
   0xa   : > { %2563 = vmatprep.subr.bf16.mxu1 (!%p288_p2), %v2947_v1  ;;  %v3096_v37 = vld [vmem:[%s3507_s4] sm:$0xff] (!%p288_p2)  }
   0xb   : > { %2544 = vmatpush3.bf16.msra.mxu0 (!%p288_p2), %v2800_v2  ;;  %v3135_v50 = vld [vmem:[%s3509_s6] sm:$0x1] (!%p288_p2) }
   0xc   : > { %2545 = vmatprep.subr.bf16.mxu0 (!%p288_p2), %v2947_v1 }
   0xd   : > { %s3514_s10 = smov (!%p323_p3, %s2370_s10), 1  ;;  %2564 = vmatpush3.bf16.msra.mxu1 %v3047_v6 }
   0xe   : > { %s2446_s17 = sshll.u32 %s3514_s10, 3  ;;  %2569 = vmatprep.subr.bf16.mxu1 %v2947_v1 }
   0xf   : > { %s327_s20 = scalar_lea.vmem %s3503_s0, %s2446_s17  ;;  %2546 = vmatpush3.bf16.msra.mxu0 %v2801_v3 }
  0x10   : > { %2547 = vmatprep.subr.bf16.mxu0 %v2947_v1  ;;  %2566 = vmatmul.mubr.bf16.vlgmr.msra.gmra.mrb[0].mxu1 %v2949_v9  ;;  %v2807_v12 = vld [vmem:[%s327_s20] sm:$0x1f]  }
  0x11   : > { %2573 = vmatprep.mubr.msk.bf16.mxu1 %vm2948_vm0, %v2947_v1  ;;  %2570 = vmatpush3.bf16.msra.mxu1 %v3081_v34 }
  0x12   : > { %2571 = vmatprep.subr.bf16.mxu1 %v2947_v1 }
  0x13   : > { %2548 = vmatpush3.bf16.msra.mxu0 %v2802_v5 }
  0x14   : > { %2549 = vmatprep.subr.bf16.mxu0 %v2947_v1 }
  0x15   : > { %2572 = vmatpush3.bf16.msra.mxu1 %v3087_v35 }
  0x16   : > { %2577 = vmatprep.subr.bf16.mxu1 %v2947_v1 }
  0x17   : > { %2550 = vmatpush3.bf16.msra.mxu0 %v2803_v7 }
  0x18   : > { %2551 = vmatprep.subr.bf16.mxu0 %v2947_v1  ;;  %2574 = vmatmul.mubr.bf16.vlgmr.msra.gmra.mrb[4].mxu1 %v2949_v9 }
  0x19   : > { %2578 = vmatpush3.bf16.msra.mxu1 %v3096_v37  ;;  %2581 = vmatprep.mubr.msk.bf16.mxu1 %vm2948_vm0, %v2947_v1 }
  0x1a   : > { %2579 = vmatprep.subr.bf16.mxu1 %v2947_v1 }
  0x1b   : > { %2552 = vmatpush3.bf16.msra.mxu0 %v2804_v8 }
  0x1c   : > { %2553 = vmatprep.subr.bf16.mxu0 %v2947_v1 }
  0x1d   : > { %2580 = vmatpush3.bf16.msra.mxu1 %v3106_v38 }
  0x1e   : > { %2585 = vmatprep.subr.bf16.mxu1 %v2947_v1 }
  0x1f   : > { %2554 = vmatpush3.bf16.msra.mxu0 %v2805_v10 }
  0x20   : > { %2555 = vmatprep.subr.bf16.mxu0 %v2947_v1 }
  0x23   : > { %2556 = vmatpush3.bf16.msra.mxu0 %v2806_v11 }
  0x24   : > { %2593 = vmatprep.subr.bf16.mxu0 %v2947_v1 }
  0x26   : > { %2558 = vmatmul.mubr.bf16.vlgmr.msra.gmra.mrb[0].mxu0 %v2807_v12 }
  0x27   : > { %2597 = vmatprep.mubr.msk.bf16.mxu0 %vm2948_vm0, %v2947_v1  ;;  %2594 = vmatpush3.bf16.msra.mxu0 %v3081_v34 }
  0x28   : > { %2595 = vmatprep.subr.bf16.mxu0 %v2947_v1 }
  0x2b   : > { %2596 = vmatpush3.bf16.msra.mxu0 %v3087_v35 }
  0x2c   : > { %2609 = vmatprep.subr.bf16.mxu0 %v2947_v1 }
  0xe3   : > { %v520_v13 = vpop.f32.mrb[0].mxu1 }
  0xe4   : > { %v2567_v14 = vpop.f32.mrb[1].mxu1 }
  0xe5   : > { %v523_v15 = vpop.f32.mrb[2].mxu1 }
  0xe6   : > { %v2568_v16 = vpop.f32.mrb[3].mxu1 }
  0xeb   : > { %v599_v45 = vpop.f32.mrb[4].mxu1 }
  0xec   : > { %v2575_v46 = vpop.f32.mrb[5].mxu1 }
  0xed   : > { %v602_v47 = vpop.f32.mrb[6].mxu1 }
  0xee   : > { %v2576_v48 = vpop.f32.mrb[7].mxu1 }
  0xf9   : > { %v447_v18 = vpop.f32.mrb[0].mxu0 }
  0xfa   : > { %v448_v19 = vadd.f32 %v2379_v17, %v447_v18  ;;  %v2559_v20 = vpop.f32.mrb[1].mxu0 }
  0xfb   : > { %v450_v21 = vpop.f32.mrb[2].mxu0 }
  0xfc   : > { %454 = vst [vmem:[#allocation2] sm:$0xff] %v448_v19  ;;  %v451_v22 = vadd.f32 %v2379_v17, %v450_v21  ;;  %v2560_v23 = vpop.f32.mrb[3].mxu0 }
  0xfe   : > { %455 = vst [vmem:[#allocation2 + $0x8] sm:$0x1] %v451_v22 }
 0x103   : > { %v469_v24 = vld [vmem:[#allocation2] sm:$0x1]  ;;  %v695_v57 = vld [vmem:[#allocation2 + $0x1] sm:$0x1]  ;;  %v887_v46 = vld [vmem:[#allocation2 + $0x2] sm:$0x1] }
 0x104   : > { %v526_v25 = vadd.f32 %v520_v13, %v469_v24 }
 0x106   : > { %534 = vrot.lane.b32.xlu0 %v526_v25, %s2950_s18  ;;  %v2391_v26 = vmul.f32 -1.442695, %v526_v25 }
 0x108   : > { %2816 = vpow2.f32 %v2391_v26 }
 0x112   : > { %v2817_v27 = vpop.eup %2816 }
 0x113   : > { %v530_v28 = vadd.f32 1.0, %v2817_v27 }
 0x115   : > { %2818 = vrcp.f32 %v530_v28 }
 0x11f   : > { %v2819_v29 = vpop.eup %2818 }
 0x120   : > { %v544_v39 = vsub.f32 1.0, %v2819_v29  ;;  %v550_v41 = vmul.f32 0.0, %v2819_v29 }
 0x178   : > { %v535_v30 = vpop.permute.xlu0 %534 }
 0x179   : > { %v537_v31 = vmul.f32 %v2819_v29, %v535_v30 }
 0x17b   : > { %539 = vrot.lane.b32.xlu0 %v537_v31, %s2951_s19 }
 0x1ed   : > { %v540_v32 = vpop.permute.xlu0 %539 }
 0x1ee   : > { %v542_v33 = vadd.f32 %v540_v32, %v526_v25 }
 0x1f0   : > { %2820 = vtanh.f32 %v542_v33 }
 0x1fa   : > { %v2821_v36 = vpop.eup %2820 }
 0x1fb   : > { %546 = vrot.lane.b32.xlu1 %v2821_v36, %s2952_s26 }
 0x26d   : > { %v547_v40 = vpop.permute.xlu1 %546 }
 0x26e   : > { %v549_v42 = vmul.f32 %v547_v40, %v544_v39 }
 0x270   : > { %v3113_v43 = vadd.f32 %v550_v41, %v549_v42 }
 0x272   : > { %v552_v44 = vpack.c.bf16 %v3113_v43, %v3113_v43 }
 0x274   : > { %606 = vrot.lane.b32.xlu1 %v552_v44, %s2952_s26 }
 0x2e6   : > { %v607_v49 = vpop.permute.xlu1 %606 }
 0x2e7   : > { %2582 = vmatmul.mubr.msk.bf16.vlgmr.msra.gmra.mrb[8].mxu1 %vm482_vm1, %v607_v49 }
 0x2e8   : > { %2586 = vmatpush3.bf16.msra.mxu1 %v3037_v4  ;;  %2589 = vmatprep.mubr.msk.bf16.mxu1 %vm2948_vm0, %v2947_v1 }
 0x2e9   : > { %2587 = vmatprep.subr.bf16.mxu1 %v2947_v1 }
 0x2ec   : > { %2588 = vmatpush3.bf16.msra.mxu1 %v3047_v6 }
 0x2ed   : > { %2601 = vmatprep.subr.bf16.mxu1 %v2947_v1 }
 0x2ef   : > { %2590 = vmatmul.mubr.msk.bf16.vlgmr.msra.gmra.mrb[12].mxu1 %vm482_vm1, %v607_v49 }
 0x2f0   : > { %2602 = vmatpush3.bf16.msra.mxu1 %v3096_v37  ;;  %2605 = vmatprep.mubr.msk.bf16.mxu1 %vm2948_vm0, %v2947_v1 }
 0x2f1   : > { %2603 = vmatprep.subr.bf16.mxu1 %v2947_v1 }
 0x2f4   : > { %2604 = vmatpush3.bf16.msra.mxu1 %v3106_v38 }
 0x2f5   : > { %2617 = vmatprep.subr.bf16.mxu1 %v2947_v1 }
 0x3ba   : > { %v657_v51 = vpop.f32.mrb[8].mxu1 }
 0x3bb   : > { %v658_v52 = vadd.f32 %v657_v51, %v599_v45  ;;  %v2583_v53 = vpop.f32.mrb[9].mxu1 }
 0x3bc   : > { %v660_v54 = vpop.f32.mrb[10].mxu1 }
 0x3bd   : > { %v663_v55 = vadd.f32 %v658_v52, %v3135_v50  ;;  %v2584_v56 = vpop.f32.mrb[11].mxu1 }
 0x3bf   : > { %671 = vrot.lane.b32.xlu0 %v663_v55, %s2950_s18  ;;  %v2397_v63 = vmul.f32 -1.442695, %v663_v55 }
 0x3c1   : > { %2822 = vpow2.f32 %v2397_v63 }
 0x3c2   : > { %v730_v58 = vpop.f32.mrb[12].mxu1 }
 0x3c3   : > { %v736_v59 = vadd.f32 %v730_v58, %v695_v57  ;;  %v2591_v60 = vpop.f32.mrb[13].mxu1 }
 0x3c4   : > { %v733_v61 = vpop.f32.mrb[14].mxu1 }
 0x3c5   : > { %744 = vrot.lane.b32.xlu1 %v736_v59, %s2950_s18  ;;  %v2592_v62 = vpop.f32.mrb[15].mxu1  ;;  %v2399_v0 = vmul.f32 -1.442695, %v736_v59 }
 0x3c7   : > { %2824 = vpow2.f32 %v2399_v0 }
 0x3cb   : > { %v2823_v2 = vpop.eup %2822 }
 0x3cc   : > { %v667_v3 = vadd.f32 1.0, %v2823_v2 }
 0x3ce   : > { %2826 = vrcp.f32 %v667_v3 }
 0x3d1   : > { %v2825_v5 = vpop.eup %2824 }
 0x3d2   : > { %v740_v7 = vadd.f32 1.0, %v2825_v5 }
 0x3d4   : > { %2828 = vrcp.f32 %v740_v7 }
 0x3d8   : > { %v2827_v8 = vpop.eup %2826 }
 0x3d9   : > { %v681_v20 = vsub.f32 1.0, %v2827_v8  ;;  %v687_v22 = vmul.f32 0.0, %v2827_v8 }
 0x3de   : > { %v2829_v11 = vpop.eup %2828 }
 0x3df   : > { %v754_v25 = vsub.f32 1.0, %v2829_v11  ;;  %v760_v28 = vmul.f32 %v2829_v11, %v3113_v43 }
 0x431   : > { %v672_v9 = vpop.permute.xlu0 %671 }
 0x432   : > { %v674_v10 = vmul.f32 %v2827_v8, %v672_v9 }
 0x434   : > { %676 = vrot.lane.b32.xlu0 %v674_v10, %s2951_s19 }
 0x437   : > { %v745_v12 = vpop.permute.xlu1 %744 }
 0x438   : > { %v747_v13 = vmul.f32 %v2829_v11, %v745_v12 }
 0x43a   : > { %749 = vrot.lane.b32.xlu1 %v747_v13, %s2951_s19 }
 0x4a6   : > { %v677_v14 = vpop.permute.xlu0 %676 }
 0x4a7   : > { %v679_v15 = vadd.f32 %v677_v14, %v663_v55 }
 0x4a9   : > { %2830 = vtanh.f32 %v679_v15 }
 0x4ac   : > { %v750_v16 = vpop.permute.xlu1 %749 }
 0x4ad   : > { %v752_v17 = vadd.f32 %v750_v16, %v736_v59 }
 0x4af   : > { %2832 = vtanh.f32 %v752_v17 }
 0x4b3   : > { %v2831_v18 = vpop.eup %2830 }
 0x4b4   : > { %683 = vrot.lane.b32.xlu0 %v2831_v18, %s2952_s26 }
 0x4b9   : > { %v2833_v19 = vpop.eup %2832 }
 0x4ba   : > { %756 = vrot.lane.b32.xlu1 %v2833_v19, %s2952_s26 }
 0x526   : > { %v684_v21 = vpop.permute.xlu0 %683 }
 0x527   : > { %v686_v23 = vmul.f32 %v684_v21, %v681_v20 }
 0x529   : > { %v3144_v24 = vadd.f32 %v687_v22, %v686_v23 }
 0x52b   : > { %v763_v26 = vpack.c.bf16 %v3144_v24, %v3144_v24 }
 0x52c   : > { %v757_v27 = vpop.permute.xlu1 %756 }
 0x52d   : > { %v759_v29 = vmul.f32 %v757_v27, %v754_v25  ;;  %765 = vrot.lane.b32.xlu0 %v763_v26, %s2952_s26 }
 0x52f   : > { %v3150_v30 = vadd.f32 %v760_v28, %v759_v29 }
 0x531   : > { %v762_v31 = vpack.c.bf16 %v3150_v30, %v3150_v30 }
 0x533   : > { %811 = vrot.lane.b32.xlu1 %v762_v31, %s2952_s26 }
 0x59f   : > { %v766_v32 = vpop.permute.xlu0 %765 }
 0x5a0   : > { %2598 = vmatmul.mubr.msk.bf16.vlgmr.msra.gmra.mrb[4].mxu0 %vm482_vm1, %v766_v32 }
 0x5a1   : > { %2610 = vmatpush3.bf16.msra.mxu0 %v3037_v4  ;;  %2613 = vmatprep.mubr.msk.bf16.mxu0 %vm2948_vm0, %v2947_v1 }
 0x5a2   : > { %2611 = vmatprep.subr.bf16.mxu0 %v2947_v1 }
 0x5a5   : > { %2612 = vmatpush3.bf16.msra.mxu0 %v3047_v6  ;;  %v812_v33 = vpop.permute.xlu1 %811 }
 0x5a6   : > { %2606 = vmatmul.mubr.msk.bf16.vlgmr.msra.gmra.mrb[16].mxu1 %vm482_vm1, %v812_v33  ;;  %2625 = vmatprep.subr.bf16.mxu0 %v2947_v1 }
 0x5a7   : > { %2618 = vmatpush3.bf16.msra.mxu1 %v3081_v34  ;;  %2621 = vmatprep.mubr.msk.bf16.mxu1 %vm2948_vm0, %v2947_v1 }
 0x5a8   : > { %2614 = vmatmul.mubr.msk.bf16.vlgmr.msra.gmra.mrb[8].mxu0 %vm482_vm1, %v812_v33  ;;  %2619 = vmatprep.subr.bf16.mxu1 %v2947_v1 }
 0x5a9   : > { %2626 = vmatpush3.bf16.msra.mxu0 %v3096_v37  ;;  %2629 = vmatprep.mubr.msk.bf16.mxu0 %vm2948_vm0, %v2947_v1 }
 0x5aa   : > { %2627 = vmatprep.subr.bf16.mxu0 %v2947_v1 }
 0x5ab   : > { %2620 = vmatpush3.bf16.msra.mxu1 %v3087_v35 }
 0x5ac   : > { %2633 = vmatprep.subr.bf16.mxu1 %v2947_v1 }
 0x5ad   : > { %2628 = vmatpush3.bf16.msra.mxu0 %v3106_v38 }
 0x5ae   : > { %2641 = vmatprep.subr.bf16.mxu0 %v2947_v1 }
 0x673   : > { %v804_v36 = vpop.f32.mrb[4].mxu0 }
 0x674   : > { %v2599_v39 = vpop.f32.mrb[5].mxu0 }
 0x675   : > { %v807_v40 = vpop.f32.mrb[6].mxu0 }
 0x676   : > { %v2600_v41 = vpop.f32.mrb[7].mxu0 }
 0x677   : > { %v1079_v41 = vld [vmem:[#allocation2 + $0x3] sm:$0x1] }
 0x679   : > { %v850_v42 = vpop.f32.mrb[16].mxu1 }
 0x67a   : > { %v851_v43 = vadd.f32 %v850_v42, %v804_v36  ;;  %v2607_v44 = vpop.f32.mrb[17].mxu1 }
 0x67b   : > { %v853_v45 = vpop.f32.mrb[18].mxu1  ;;  %v922_v47 = vpop.f32.mrb[8].mxu0 }
 0x67c   : > { %v856_v48 = vadd.f32 %v851_v43, %v3135_v50  ;;  %v928_v49 = vadd.f32 %v922_v47, %v887_v46  ;;  %v2608_v51 = vpop.f32.mrb[19].mxu1  ;;  %v2615_v52 = vpop.f32.mrb[9].mxu0 }
 0x67d   : > { %v925_v53 = vpop.f32.mrb[10].mxu0 }
 0x67e   : > { %864 = vrot.lane.b32.xlu0 %v856_v48, %s2950_s18  ;;  %936 = vrot.lane.b32.xlu1 %v928_v49, %s2950_s18  ;;  %v2616_v54 = vpop.f32.mrb[11].mxu0  ;;  %v2402_v55 = vmul.f32 -1.442695, %v856_v48  ;;  %v2404_v56 = vmul.f32 -1.442695, %v928_v49 }
 0x680   : > { %2834 = vpow2.f32 %v2402_v55 }
 0x681   : > { %2836 = vpow2.f32 %v2404_v56 }
 0x68a   : > { %v2835_v57 = vpop.eup %2834 }
 0x68b   : > { %v2837_v58 = vpop.eup %2836  ;;  %v860_v59 = vadd.f32 1.0, %v2835_v57 }
 0x68c   : > { %v932_v60 = vadd.f32 1.0, %v2837_v58 }
 0x68d   : > { %2838 = vrcp.f32 %v860_v59 }
 0x68e   : > { %2840 = vrcp.f32 %v932_v60 }
 0x697   : > { %v2839_v61 = vpop.eup %2838 }
 0x698   : > { %v2841_v62 = vpop.eup %2840  ;;  %v874_v12 = vsub.f32 1.0, %v2839_v61  ;;  %v880_v15 = vmul.f32 %v2839_v61, %v3144_v24 }
 0x699   : > { %v946_v14 = vsub.f32 1.0, %v2841_v62  ;;  %v952_v18 = vmul.f32 %v2841_v62, %v3150_v30 }
 0x6f0   : > { %v865_v63 = vpop.permute.xlu0 %864  ;;  %v937_v0 = vpop.permute.xlu1 %936 }
 0x6f1   : > { %v867_v2 = vmul.f32 %v2839_v61, %v865_v63  ;;  %v939_v3 = vmul.f32 %v2841_v62, %v937_v0 }
 0x6f3   : > { %869 = vrot.lane.b32.xlu0 %v867_v2, %s2951_s19  ;;  %941 = vrot.lane.b32.xlu1 %v939_v3, %s2951_s19 }
 0x765   : > { %v870_v5 = vpop.permute.xlu0 %869  ;;  %v942_v7 = vpop.permute.xlu1 %941 }
 0x766   : > { %v872_v8 = vadd.f32 %v870_v5, %v856_v48  ;;  %v944_v9 = vadd.f32 %v942_v7, %v928_v49 }
 0x768   : > { %2842 = vtanh.f32 %v872_v8 }
 0x769   : > { %2844 = vtanh.f32 %v944_v9 }
 0x772   : > { %v2843_v10 = vpop.eup %2842 }
 0x773   : > { %v2845_v11 = vpop.eup %2844  ;;  %876 = vrot.lane.b32.xlu0 %v2843_v10, %s2952_s26 }
 0x774   : > { %948 = vrot.lane.b32.xlu1 %v2845_v11, %s2952_s26 }
 0x7e5   : > { %v877_v13 = vpop.permute.xlu0 %876 }
 0x7e6   : > { %v879_v16 = vmul.f32 %v877_v13, %v874_v12  ;;  %v949_v17 = vpop.permute.xlu1 %948 }
 0x7e7   : > { %v951_v19 = vmul.f32 %v949_v17, %v946_v14 }
 0x7e8   : > { %v3185_v20 = vadd.f32 %v880_v15, %v879_v16 }
 0x7e9   : > { %v3187_v21 = vadd.f32 %v952_v18, %v951_v19 }
 0x7ea   : > { %v955_v22 = vpack.c.bf16 %v3185_v20, %v3185_v20 }
 0x7eb   : > { %v954_v23 = vpack.c.bf16 %v3187_v21, %v3187_v21 }
 0x7ec   : > { %957 = vrot.lane.b32.xlu0 %v955_v22, %s2952_s26 }
 0x7ed   : > { %1003 = vrot.lane.b32.xlu1 %v954_v23, %s2952_s26 }
 0x85e   : > { %v958_v25 = vpop.permute.xlu0 %957 }
 0x85f   : > { %v1004_v26 = vpop.permute.xlu1 %1003  ;;  %2622 = vmatmul.mubr.msk.bf16.vlgmr.msra.gmra.mrb[20].mxu1 %vm482_vm1, %v958_v25 }
 0x860   : > { %2630 = vmatmul.mubr.msk.bf16.vlgmr.msra.gmra.mrb[12].mxu0 %vm482_vm1, %v1004_v26  ;;  %2634 = vmatpush3.bf16.msra.mxu1 %v3037_v4 }
 0x861   : > { %2635 = vmatprep.subr.bf16.mxu1 %v2947_v1  ;;  %2637 = vmatprep.mubr.msk.bf16.mxu1 %vm2948_vm0, %v2947_v1 }
 0x862   : > { %2642 = vmatpush3.bf16.msra.mxu0 %v3081_v34  ;;  %2645 = vmatprep.mubr.msk.bf16.mxu0 %vm2948_vm0, %v2947_v1 }
 0x863   : > { %2643 = vmatprep.subr.bf16.mxu0 %v2947_v1 }
 0x864   : > { %2636 = vmatpush3.bf16.msra.mxu1 %v3047_v6 }
 0x865   : > { %2649 = vmatprep.subr.bf16.mxu1 %v2947_v1 }
 0x866   : > { %2644 = vmatpush3.bf16.msra.mxu0 %v3087_v35 }
 0x867   : > { %2638 = vmatmul.mubr.msk.bf16.vlgmr.msra.gmra.mrb[24].mxu1 %vm482_vm1, %v1004_v26  ;;  %2657 = vmatprep.subr.bf16.mxu0 %v2947_v1 }
 0x868   : > { %2650 = vmatpush3.bf16.msra.mxu1 %v3096_v37  ;;  %2653 = vmatprep.mubr.msk.bf16.mxu1 %vm2948_vm0, %v2947_v1 }
 0x869   : > { %2651 = vmatprep.subr.bf16.mxu1 %v2947_v1 }
 0x86c   : > { %2652 = vmatpush3.bf16.msra.mxu1 %v3106_v38 }
 0x86d   : > { %2665 = vmatprep.subr.bf16.mxu1 %v2947_v1 }
 0x932   : > { %v996_v27 = vpop.f32.mrb[20].mxu1 }
 0x933   : > { %v1042_v28 = vpop.f32.mrb[12].mxu0  ;;  %v2623_v29 = vpop.f32.mrb[21].mxu1 }
 0x934   : > { %v1043_v30 = vadd.f32 %v1042_v28, %v996_v27  ;;  %v2631_v31 = vpop.f32.mrb[13].mxu0  ;;  %v999_v32 = vpop.f32.mrb[22].mxu1 }
 0x935   : > { %v1045_v33 = vpop.f32.mrb[14].mxu0  ;;  %v2624_v36 = vpop.f32.mrb[23].mxu1 }
 0x936   : > { %v1048_v39 = vadd.f32 %v1043_v30, %v3135_v50  ;;  %v2632_v40 = vpop.f32.mrb[15].mxu0  ;;  %v1271_v30 = vld [vmem:[#allocation2 + $0x4] sm:$0x1] }
 0x938   : > { %1056 = vrot.lane.b32.xlu0 %v1048_v39, %s2950_s18  ;;  %v2407_v47 = vmul.f32 -1.442695, %v1048_v39 }
 0x93a   : > { %v1114_v42 = vpop.f32.mrb[24].mxu1  ;;  %2846 = vpow2.f32 %v2407_v47 }
 0x93b   : > { %v1120_v43 = vadd.f32 %v1114_v42, %v1079_v41  ;;  %v2639_v44 = vpop.f32.mrb[25].mxu1 }
 0x93c   : > { %v1117_v45 = vpop.f32.mrb[26].mxu1 }
 0x93d   : > { %1128 = vrot.lane.b32.xlu1 %v1120_v43, %s2950_s18  ;;  %v2640_v46 = vpop.f32.mrb[27].mxu1  ;;  %v2409_v48 = vmul.f32 -1.442695, %v1120_v43 }
 0x93f   : > { %2848 = vpow2.f32 %v2409_v48 }
 0x944   : > { %v2847_v49 = vpop.eup %2846 }
 0x945   : > { %v1052_v51 = vadd.f32 1.0, %v2847_v49 }
 0x947   : > { %2850 = vrcp.f32 %v1052_v51 }
 0x949   : > { %v2849_v52 = vpop.eup %2848 }
 0x94a   : > { %v1124_v53 = vadd.f32 1.0, %v2849_v52 }
 0x94c   : > { %2852 = vrcp.f32 %v1124_v53 }
 0x951   : > { %v2851_v54 = vpop.eup %2850 }
 0x952   : > { %v1066_v3 = vsub.f32 1.0, %v2851_v54  ;;  %v1072_v7 = vmul.f32 %v2851_v54, %v3185_v20 }
 0x956   : > { %v2853_v57 = vpop.eup %2852 }
 0x957   : > { %v1138_v10 = vsub.f32 1.0, %v2853_v57  ;;  %v1144_v13 = vmul.f32 %v2853_v57, %v3187_v21 }
 0x9aa   : > { %v1057_v55 = vpop.permute.xlu0 %1056 }
 0x9ab   : > { %v1059_v56 = vmul.f32 %v2851_v54, %v1057_v55 }
 0x9ad   : > { %1061 = vrot.lane.b32.xlu0 %v1059_v56, %s2951_s19 }
 0x9af   : > { %v1129_v58 = vpop.permute.xlu1 %1128 }
 0x9b0   : > { %v1131_v59 = vmul.f32 %v2853_v57, %v1129_v58 }
 0x9b2   : > { %1133 = vrot.lane.b32.xlu1 %v1131_v59, %s2951_s19 }
 0xa1f   : > { %v1062_v60 = vpop.permute.xlu0 %1061 }
 0xa20   : > { %v1064_v61 = vadd.f32 %v1062_v60, %v1048_v39 }
 0xa22   : > { %2854 = vtanh.f32 %v1064_v61 }
 0xa24   : > { %v1134_v62 = vpop.permute.xlu1 %1133 }
 0xa25   : > { %v1136_v63 = vadd.f32 %v1134_v62, %v1120_v43 }
 0xa27   : > { %2856 = vtanh.f32 %v1136_v63 }
 0xa2c   : > { %v2855_v0 = vpop.eup %2854 }
 0xa2d   : > { %1068 = vrot.lane.b32.xlu0 %v2855_v0, %s2952_s26 }
 0xa31   : > { %v2857_v2 = vpop.eup %2856 }
 0xa32   : > { %1140 = vrot.lane.b32.xlu1 %v2857_v2, %s2952_s26 }
 0xa9f   : > { %v1069_v5 = vpop.permute.xlu0 %1068 }
 0xaa0   : > { %v1071_v8 = vmul.f32 %v1069_v5, %v1066_v3 }
 0xaa2   : > { %v3224_v9 = vadd.f32 %v1072_v7, %v1071_v8 }
 0xaa4   : > { %v1141_v11 = vpop.permute.xlu1 %1140  ;;  %v1147_v12 = vpack.c.bf16 %v3224_v9, %v3224_v9 }
 0xaa5   : > { %v1143_v14 = vmul.f32 %v1141_v11, %v1138_v10 }
 0xaa6   : > { %1149 = vrot.lane.b32.xlu0 %v1147_v12, %s2952_s26 }
 0xaa7   : > { %v3230_v15 = vadd.f32 %v1144_v13, %v1143_v14 }
 0xaa9   : > { %v1146_v16 = vpack.c.bf16 %v3230_v15, %v3230_v15 }
 0xaab   : > { %1195 = vrot.lane.b32.xlu1 %v1146_v16, %s2952_s26 }
 0xb18   : > { %v1150_v17 = vpop.permute.xlu0 %1149 }
 0xb19   : > { %2646 = vmatmul.mubr.msk.bf16.vlgmr.msra.gmra.mrb[16].mxu0 %vm482_vm1, %v1150_v17 }
 0xb1a   : > { %2658 = vmatpush3.bf16.msra.mxu0 %v3037_v4  ;;  %2661 = vmatprep.mubr.msk.bf16.mxu0 %vm2948_vm0, %v2947_v1 }
 0xb1b   : > { %2659 = vmatprep.subr.bf16.mxu0 %v2947_v1 }
 0xb1d   : > { %v1196_v18 = vpop.permute.xlu1 %1195 }
 0xb1e   : > { %2660 = vmatpush3.bf16.msra.mxu0 %v3047_v6  ;;  %2654 = vmatmul.mubr.msk.bf16.vlgmr.msra.gmra.mrb[28].mxu1 %vm482_vm1, %v1196_v18 }
 0xb1f   : > { %2673 = vmatprep.subr.bf16.mxu0 %v2947_v1  ;;  %2666 = vmatpush3.bf16.msra.mxu1 %v3081_v34 }
 0xb20   : > { %2667 = vmatprep.subr.bf16.mxu1 %v2947_v1  ;;  %2669 = vmatprep.mubr.msk.bf16.mxu1 %vm2948_vm0, %v2947_v1 }
 0xb21   : > { %2662 = vmatmul.mubr.msk.bf16.vlgmr.msra.gmra.mrb[20].mxu0 %vm482_vm1, %v1196_v18 }
 0xb22   : > { %2674 = vmatpush3.bf16.msra.mxu0 %v3096_v37  ;;  %2677 = vmatprep.mubr.msk.bf16.mxu0 %vm2948_vm0, %v2947_v1 }
 0xb23   : > { %2675 = vmatprep.subr.bf16.mxu0 %v2947_v1  ;;  %2668 = vmatpush3.bf16.msra.mxu1 %v3087_v35 }
 0xb24   : > { %2681 = vmatprep.subr.bf16.mxu1 %v2947_v1 }
 0xb26   : > { %2676 = vmatpush3.bf16.msra.mxu0 %v3106_v38 }
 0xb27   : > { %2689 = vmatprep.subr.bf16.mxu0 %v2947_v1 }
 0xbec   : > { %v1188_v19 = vpop.f32.mrb[16].mxu0 }
 0xbed   : > { %v2647_v21 = vpop.f32.mrb[17].mxu0 }
 0xbee   : > { %v1191_v22 = vpop.f32.mrb[18].mxu0 }
 0xbef   : > { %v2648_v23 = vpop.f32.mrb[19].mxu0 }
 0xbf1   : > { %v1234_v25 = vpop.f32.mrb[28].mxu1 }
 0xbf2   : > { %v1235_v26 = vadd.f32 %v1234_v25, %v1188_v19  ;;  %v2655_v27 = vpop.f32.mrb[29].mxu1 }
 0xbf3   : > { %v1237_v28 = vpop.f32.mrb[30].mxu1 }
 0xbf4   : > { %v1240_v29 = vadd.f32 %v1235_v26, %v3135_v50  ;;  %v1306_v31 = vpop.f32.mrb[20].mxu0  ;;  %v2656_v32 = vpop.f32.mrb[31].mxu1  ;;  %v1463_v26 = vld [vmem:[#allocation2 + $0x5] sm:$0x1] }
 0xbf5   : > { %v1312_v33 = vadd.f32 %v1306_v31, %v1271_v30  ;;  %v2663_v36 = vpop.f32.mrb[21].mxu0 }
 0xbf6   : > { %v1309_v39 = vpop.f32.mrb[22].mxu0  ;;  %1248 = vrot.lane.b32.xlu0 %v1240_v29, %s2950_s18  ;;  %v2412_v41 = vmul.f32 -1.442695, %v1240_v29 }
 0xbf7   : > { %1320 = vrot.lane.b32.xlu1 %v1312_v33, %s2950_s18  ;;  %v2664_v40 = vpop.f32.mrb[23].mxu0  ;;  %v2414_v42 = vmul.f32 -1.442695, %v1312_v33 }
 0xbf8   : > { %2858 = vpow2.f32 %v2412_v41 }
 0xbf9   : > { %2860 = vpow2.f32 %v2414_v42 }
 0xc02   : > { %v2859_v43 = vpop.eup %2858 }
 0xc03   : > { %v2861_v44 = vpop.eup %2860  ;;  %v1244_v45 = vadd.f32 1.0, %v2859_v43 }
 0xc04   : > { %v1316_v46 = vadd.f32 1.0, %v2861_v44 }
 0xc05   : > { %2862 = vrcp.f32 %v1244_v45 }
 0xc06   : > { %2864 = vrcp.f32 %v1316_v46 }
 0xc0f   : > { %v2863_v47 = vpop.eup %2862 }
 0xc10   : > { %v2865_v49 = vpop.eup %2864  ;;  %v1258_v60 = vsub.f32 1.0, %v2863_v47  ;;  %v1264_v63 = vmul.f32 %v2863_v47, %v3224_v9 }
 0xc11   : > { %v1330_v62 = vsub.f32 1.0, %v2865_v49  ;;  %v1336_v3 = vmul.f32 %v2865_v49, %v3230_v15 }
 0xc68   : > { %v1249_v48 = vpop.permute.xlu0 %1248 }
 0xc69   : > { %v1251_v51 = vmul.f32 %v2863_v47, %v1249_v48  ;;  %v1321_v52 = vpop.permute.xlu1 %1320 }
 0xc6a   : > { %v1323_v53 = vmul.f32 %v2865_v49, %v1321_v52 }
 0xc6b   : > { %1253 = vrot.lane.b32.xlu0 %v1251_v51, %s2951_s19 }
 0xc6c   : > { %1325 = vrot.lane.b32.xlu1 %v1323_v53, %s2951_s19 }
 0xcdd   : > { %v1254_v54 = vpop.permute.xlu0 %1253 }
 0xcde   : > { %v1256_v55 = vadd.f32 %v1254_v54, %v1240_v29  ;;  %v1326_v56 = vpop.permute.xlu1 %1325 }
 0xcdf   : > { %v1328_v57 = vadd.f32 %v1326_v56, %v1312_v33 }
 0xce0   : > { %2866 = vtanh.f32 %v1256_v55 }
 0xce1   : > { %2868 = vtanh.f32 %v1328_v57 }
 0xcea   : > { %v2867_v58 = vpop.eup %2866 }
 0xceb   : > { %v2869_v59 = vpop.eup %2868  ;;  %1260 = vrot.lane.b32.xlu0 %v2867_v58, %s2952_s26 }
 0xcec   : > { %1332 = vrot.lane.b32.xlu1 %v2869_v59, %s2952_s26 }
 0xd5d   : > { %v1261_v61 = vpop.permute.xlu0 %1260 }
 0xd5e   : > { %v1263_v0 = vmul.f32 %v1261_v61, %v1258_v60  ;;  %v1333_v2 = vpop.permute.xlu1 %1332 }
 0xd5f   : > { %v1335_v5 = vmul.f32 %v1333_v2, %v1330_v62 }
 0xd60   : > { %v3265_v7 = vadd.f32 %v1264_v63, %v1263_v0 }
 0xd61   : > { %v3267_v8 = vadd.f32 %v1336_v3, %v1335_v5 }
 0xd62   : > { %v1339_v10 = vpack.c.bf16 %v3265_v7, %v3265_v7 }
 0xd63   : > { %v1338_v11 = vpack.c.bf16 %v3267_v8, %v3267_v8 }
 0xd64   : > { %1341 = vrot.lane.b32.xlu0 %v1339_v10, %s2952_s26 }
 0xd65   : > { %1387 = vrot.lane.b32.xlu1 %v1338_v11, %s2952_s26 }
 0xdd6   : > { %v1342_v12 = vpop.permute.xlu0 %1341 }
 0xdd7   : > { %v1388_v13 = vpop.permute.xlu1 %1387  ;;  %2670 = vmatmul.mubr.msk.bf16.vlgmr.msra.gmra.mrb[32].mxu1 %vm482_vm1, %v1342_v12 }
 0xdd8   : > { %2678 = vmatmul.mubr.msk.bf16.vlgmr.msra.gmra.mrb[24].mxu0 %vm482_vm1, %v1388_v13  ;;  %2682 = vmatpush3.bf16.msra.mxu1 %v3037_v4 }
 0xdd9   : > { %2683 = vmatprep.subr.bf16.mxu1 %v2947_v1  ;;  %2685 = vmatprep.mubr.msk.bf16.mxu1 %vm2948_vm0, %v2947_v1 }
 0xdda   : > { %2690 = vmatpush3.bf16.msra.mxu0 %v3081_v34  ;;  %2693 = vmatprep.mubr.msk.bf16.mxu0 %vm2948_vm0, %v2947_v1 }
 0xddb   : > { %2691 = vmatprep.subr.bf16.mxu0 %v2947_v1 }
 0xddc   : > { %2684 = vmatpush3.bf16.msra.mxu1 %v3047_v6 }
 0xddd   : > { %2697 = vmatprep.subr.bf16.mxu1 %v2947_v1 }
 0xdde   : > { %2692 = vmatpush3.bf16.msra.mxu0 %v3087_v35 }
 0xddf   : > { %2686 = vmatmul.mubr.msk.bf16.vlgmr.msra.gmra.mrb[36].mxu1 %vm482_vm1, %v1388_v13  ;;  %2705 = vmatprep.subr.bf16.mxu0 %v2947_v1 }
 0xde0   : > { %2698 = vmatpush3.bf16.msra.mxu1 %v3096_v37  ;;  %2701 = vmatprep.mubr.msk.bf16.mxu1 %vm2948_vm0, %v2947_v1 }
 0xde1   : > { %2699 = vmatprep.subr.bf16.mxu1 %v2947_v1 }
 0xde4   : > { %2700 = vmatpush3.bf16.msra.mxu1 %v3106_v38 }
 0xde5   : > { %2713 = vmatprep.subr.bf16.mxu1 %v2947_v1 }
 0xeaa   : > { %v1380_v14 = vpop.f32.mrb[32].mxu1 }
 0xeab   : > { %v1426_v15 = vpop.f32.mrb[24].mxu0  ;;  %v2671_v16 = vpop.f32.mrb[33].mxu1 }
 0xeac   : > { %v1427_v17 = vadd.f32 %v1426_v15, %v1380_v14  ;;  %v2679_v18 = vpop.f32.mrb[25].mxu0  ;;  %v1383_v19 = vpop.f32.mrb[34].mxu1 }
 0xead   : > { %v1429_v21 = vpop.f32.mrb[26].mxu0  ;;  %v2672_v22 = vpop.f32.mrb[35].mxu1 }
 0xeae   : > { %v1432_v23 = vadd.f32 %v1427_v17, %v3135_v50  ;;  %v2680_v25 = vpop.f32.mrb[27].mxu0  ;;  %v1655_v17 = vld [vmem:[#allocation2 + $0x6] sm:$0x1] }
 0xeb0   : > { %1440 = vrot.lane.b32.xlu0 %v1432_v23, %s2950_s18  ;;  %v2417_v32 = vmul.f32 -1.442695, %v1432_v23 }
 0xeb2   : > { %v1498_v27 = vpop.f32.mrb[36].mxu1  ;;  %2870 = vpow2.f32 %v2417_v32 }
 0xeb3   : > { %v1504_v28 = vadd.f32 %v1498_v27, %v1463_v26  ;;  %v2687_v29 = vpop.f32.mrb[37].mxu1 }
 0xeb4   : > { %v1501_v30 = vpop.f32.mrb[38].mxu1 }
 0xeb5   : > { %1512 = vrot.lane.b32.xlu1 %v1504_v28, %s2950_s18  ;;  %v2688_v31 = vpop.f32.mrb[39].mxu1  ;;  %v2419_v33 = vmul.f32 -1.442695, %v1504_v28 }
 0xeb7   : > { %2872 = vpow2.f32 %v2419_v33 }
 0xebc   : > { %v2871_v36 = vpop.eup %2870 }
 0xebd   : > { %v1436_v39 = vadd.f32 1.0, %v2871_v36 }
 0xebf   : > { %2874 = vrcp.f32 %v1436_v39 }
 0xec1   : > { %v2873_v40 = vpop.eup %2872 }
 0xec2   : > { %v1508_v41 = vadd.f32 1.0, %v2873_v40 }
 0xec4   : > { %2876 = vrcp.f32 %v1508_v41 }
 0xec9   : > { %v2875_v42 = vpop.eup %2874 }
 0xeca   : > { %v1450_v55 = vsub.f32 1.0, %v2875_v42  ;;  %v1456_v57 = vmul.f32 %v2875_v42, %v3265_v7 }
 0xece   : > { %v2877_v45 = vpop.eup %2876 }
 0xecf   : > { %v1522_v60 = vsub.f32 1.0, %v2877_v45  ;;  %v1528_v63 = vmul.f32 %v2877_v45, %v3267_v8 }
 0xf22   : > { %v1441_v43 = vpop.permute.xlu0 %1440 }
 0xf23   : > { %v1443_v44 = vmul.f32 %v2875_v42, %v1441_v43 }
 0xf25   : > { %1445 = vrot.lane.b32.xlu0 %v1443_v44, %s2951_s19 }
 0xf27   : > { %v1513_v46 = vpop.permute.xlu1 %1512 }
 0xf28   : > { %v1515_v47 = vmul.f32 %v2877_v45, %v1513_v46 }
 0xf2a   : > { %1517 = vrot.lane.b32.xlu1 %v1515_v47, %s2951_s19 }
 0xf97   : > { %v1446_v48 = vpop.permute.xlu0 %1445 }
 0xf98   : > { %v1448_v49 = vadd.f32 %v1446_v48, %v1432_v23 }
 0xf9a   : > { %2878 = vtanh.f32 %v1448_v49 }
 0xf9c   : > { %v1518_v51 = vpop.permute.xlu1 %1517 }
 0xf9d   : > { %v1520_v52 = vadd.f32 %v1518_v51, %v1504_v28 }
 0xf9f   : > { %2880 = vtanh.f32 %v1520_v52 }
 0xfa4   : > { %v2879_v53 = vpop.eup %2878 }
 0xfa5   : > { %1452 = vrot.lane.b32.xlu0 %v2879_v53, %s2952_s26 }
 0xfa9   : > { %v2881_v54 = vpop.eup %2880 }
 0xfaa   : > { %1524 = vrot.lane.b32.xlu1 %v2881_v54, %s2952_s26 }
0x1017   : > { %v1453_v56 = vpop.permute.xlu0 %1452 }
0x1018   : > { %v1455_v58 = vmul.f32 %v1453_v56, %v1450_v55 }
0x101a   : > { %v3304_v59 = vadd.f32 %v1456_v57, %v1455_v58 }
0x101c   : > { %v1525_v61 = vpop.permute.xlu1 %1524  ;;  %v1531_v62 = vpack.c.bf16 %v3304_v59, %v3304_v59 }
0x101d   : > { %v1527_v0 = vmul.f32 %v1525_v61, %v1522_v60 }
0x101e   : > { %1533 = vrot.lane.b32.xlu0 %v1531_v62, %s2952_s26 }
0x101f   : > { %v3310_v2 = vadd.f32 %v1528_v63, %v1527_v0  ;;  %v3360_v63 = vld [vmem:[%s3505_s2] sm:$0xff]   ;;  %v3373_v0 = vld [vmem:[%s3505_s2 + $0x8] sm:$0xff]  }
0x1021   : > { %v1530_v3 = vpack.c.bf16 %v3310_v2, %v3310_v2 }
0x1023   : > { %1579 = vrot.lane.b32.xlu1 %v1530_v3, %s2952_s26 }
0x1090   : > { %v1534_v5 = vpop.permute.xlu0 %1533 }
0x1091   : > { %2694 = vmatmul.mubr.msk.bf16.vlgmr.msra.gmra.mrb[28].mxu0 %vm482_vm1, %v1534_v5 }
0x1092   : > { %2706 = vmatpush3.bf16.msra.mxu0 %v3037_v4  ;;  %2709 = vmatprep.mubr.msk.bf16.mxu0 %vm2948_vm0, %v2947_v1 }
0x1093   : > { %2707 = vmatprep.subr.bf16.mxu0 %v2947_v1 }
0x1095   : > { %v1580_v8 = vpop.permute.xlu1 %1579 }
0x1096   : > { %2708 = vmatpush3.bf16.msra.mxu0 %v3047_v6  ;;  %2702 = vmatmul.mubr.msk.bf16.vlgmr.msra.gmra.mrb[40].mxu1 %vm482_vm1, %v1580_v8 }
0x1097   : > { %2721 = vmatprep.subr.bf16.mxu0 %v2947_v1  ;;  %2714 = vmatpush3.bf16.msra.mxu1 %v3081_v34 }
0x1098   : > { %2715 = vmatprep.subr.bf16.mxu1 %v2947_v1  ;;  %2717 = vmatprep.mubr.msk.bf16.mxu1 %vm2948_vm0, %v2947_v1 }
0x1099   : > { %2710 = vmatmul.mubr.msk.bf16.vlgmr.msra.gmra.mrb[32].mxu0 %vm482_vm1, %v1580_v8 }
0x109a   : > { %2722 = vmatpush3.bf16.msra.mxu0 %v3096_v37  ;;  %2725 = vmatprep.mubr.msk.bf16.mxu0 %vm2948_vm0, %v2947_v1 }
0x109b   : > { %2723 = vmatprep.subr.bf16.mxu0 %v2947_v1  ;;  %2716 = vmatpush3.bf16.msra.mxu1 %v3087_v35 }
0x109c   : > { %2729 = vmatprep.subr.bf16.mxu1 %v2947_v1 }
0x109e   : > { %2724 = vmatpush3.bf16.msra.mxu0 %v3106_v38 }
0x109f   : > { %2737 = vmatprep.subr.bf16.mxu0 %v2947_v1 }
0x1164   : > { %v1572_v4 = vpop.f32.mrb[28].mxu0 }
0x1165   : > { %v2695_v6 = vpop.f32.mrb[29].mxu0 }
0x1166   : > { %v1575_v10 = vpop.f32.mrb[30].mxu0 }
0x1167   : > { %v2696_v11 = vpop.f32.mrb[31].mxu0 }
0x1169   : > { %v1618_v12 = vpop.f32.mrb[40].mxu1 }
0x116a   : > { %v1619_v13 = vadd.f32 %v1618_v12, %v1572_v4  ;;  %v2703_v14 = vpop.f32.mrb[41].mxu1 }
0x116b   : > { %v1621_v15 = vpop.f32.mrb[42].mxu1 }
0x116c   : > { %v1624_v16 = vadd.f32 %v1619_v13, %v3135_v50  ;;  %v1690_v18 = vpop.f32.mrb[32].mxu0  ;;  %v2704_v19 = vpop.f32.mrb[43].mxu1  ;;  %v1847_v13 = vld [vmem:[#allocation2 + $0x7] sm:$0x1] }
0x116d   : > { %v1696_v35 = vadd.f32 %v1690_v18, %v1655_v17  ;;  %v2711_v21 = vpop.f32.mrb[33].mxu0 }
0x116e   : > { %v1693_v22 = vpop.f32.mrb[34].mxu0  ;;  %1632 = vrot.lane.b32.xlu0 %v1624_v16, %s2950_s18  ;;  %v2422_v25 = vmul.f32 -1.442695, %v1624_v16 }
0x116f   : > { %1704 = vrot.lane.b32.xlu1 %v1696_v35, %s2950_s18  ;;  %v2712_v23 = vpop.f32.mrb[35].mxu0  ;;  %v2424_v26 = vmul.f32 -1.442695, %v1696_v35 }
0x1170   : > { %2882 = vpow2.f32 %v2422_v25 }
0x1171   : > { %2884 = vpow2.f32 %v2424_v26 }
0x117a   : > { %v2883_v27 = vpop.eup %2882 }
0x117b   : > { %v2885_v28 = vpop.eup %2884  ;;  %v1628_v29 = vadd.f32 1.0, %v2883_v27 }
0x117c   : > { %v1700_v30 = vadd.f32 1.0, %v2885_v28 }
0x117d   : > { %2886 = vrcp.f32 %v1628_v29 }
0x117e   : > { %2888 = vrcp.f32 %v1700_v30 }
0x1187   : > { %v2887_v31 = vpop.eup %2886 }
0x1188   : > { %v2889_v33 = vpop.eup %2888  ;;  %v1642_v47 = vsub.f32 1.0, %v2887_v31  ;;  %v1648_v51 = vmul.f32 %v2887_v31, %v3304_v59 }
0x1189   : > { %v1714_v49 = vsub.f32 1.0, %v2889_v33  ;;  %v1720_v54 = vmul.f32 %v2889_v33, %v3310_v2  ;;  %v3380_v2 = vld [vmem:[%s3508_s5 + $0x8] sm:$0xff]  }
0x11e0   : > { %v1633_v32 = vpop.permute.xlu0 %1632 }
0x11e1   : > { %v1635_v36 = vmul.f32 %v2887_v31, %v1633_v32  ;;  %v1705_v39 = vpop.permute.xlu1 %1704 }
0x11e2   : > { %v1707_v40 = vmul.f32 %v2889_v33, %v1705_v39 }
0x11e3   : > { %1637 = vrot.lane.b32.xlu0 %v1635_v36, %s2951_s19 }
0x11e4   : > { %1709 = vrot.lane.b32.xlu1 %v1707_v40, %s2951_s19 }
0x1255   : > { %v1638_v41 = vpop.permute.xlu0 %1637 }
0x1256   : > { %v1640_v42 = vadd.f32 %v1638_v41, %v1624_v16  ;;  %v1710_v43 = vpop.permute.xlu1 %1709 }
0x1257   : > { %v1712_v44 = vadd.f32 %v1710_v43, %v1696_v35 }
0x1258   : > { %2890 = vtanh.f32 %v1640_v42 }
0x1259   : > { %2892 = vtanh.f32 %v1712_v44 }
0x1262   : > { %v2891_v45 = vpop.eup %2890 }
0x1263   : > { %v2893_v46 = vpop.eup %2892  ;;  %1644 = vrot.lane.b32.xlu0 %v2891_v45, %s2952_s26 }
0x1264   : > { %1716 = vrot.lane.b32.xlu1 %v2893_v46, %s2952_s26 }
0x12d5   : > { %v1645_v48 = vpop.permute.xlu0 %1644 }
0x12d6   : > { %v1647_v52 = vmul.f32 %v1645_v48, %v1642_v47  ;;  %v1717_v53 = vpop.permute.xlu1 %1716 }
0x12d7   : > { %v1719_v55 = vmul.f32 %v1717_v53, %v1714_v49 }
0x12d8   : > { %v3345_v56 = vadd.f32 %v1648_v51, %v1647_v52 }
0x12d9   : > { %v3347_v57 = vadd.f32 %v1720_v54, %v1719_v55  ;;  %v2935_v55 = vld [vmem:[%s3508_s5] sm:$0xff]  }
0x12da   : > { %v1723_v58 = vpack.c.bf16 %v3345_v56, %v3345_v56 }
0x12db   : > { %v1722_v60 = vpack.c.bf16 %v3347_v57, %v3347_v57 }
0x12dc   : > { %1725 = vrot.lane.b32.xlu0 %v1723_v58, %s2952_s26  ;;  %v2937_v58 = vld [vmem:[%s3507_s4 + $0x8] sm:$0xff]  }
0x12dd   : > { %1771 = vrot.lane.b32.xlu1 %v1722_v60, %s2952_s26 }
0x134e   : > { %v1726_v61 = vpop.permute.xlu0 %1725 }
0x134f   : > { %v1772_v62 = vpop.permute.xlu1 %1771  ;;  %2718 = vmatmul.mubr.msk.bf16.vlgmr.msra.gmra.mrb[44].mxu1 %vm482_vm1, %v1726_v61 }
0x1350   : > { %2726 = vmatmul.mubr.msk.bf16.vlgmr.msra.gmra.mrb[36].mxu0 %vm482_vm1, %v1772_v62  ;;  %2730 = vmatpush3.bf16.msra.mxu1 %v3360_v63 }
0x1351   : > { %2731 = vmatprep.subr.bf16.mxu1 %v2947_v1  ;;  %2733 = vmatprep.mubr.msk.bf16.mxu1 %vm2948_vm0, %v2947_v1 }
0x1352   : > { %2738 = vmatpush3.bf16.msra.mxu0 %v3081_v34  ;;  %2741 = vmatprep.mubr.msk.bf16.mxu0 %vm2948_vm0, %v2947_v1 }
0x1353   : > { %2739 = vmatprep.subr.bf16.mxu0 %v2947_v1 }
0x1354   : > { %2732 = vmatpush3.bf16.msra.mxu1 %v3373_v0 }
0x1355   : > { %2745 = vmatprep.subr.bf16.mxu1 %v2947_v1 }
0x1356   : > { %2740 = vmatpush3.bf16.msra.mxu0 %v3380_v2 }
0x1357   : > { %2734 = vmatmul.mubr.msk.bf16.vlgmr.msra.gmra.mrb[48].mxu1 %vm482_vm1, %v1772_v62  ;;  %2753 = vmatprep.subr.bf16.mxu0 %v2947_v1 }
0x1358   : > { %2746 = vmatpush3.bf16.msra.mxu1 %v3096_v37  ;;  %2749 = vmatprep.mubr.msk.bf16.mxu1 %vm2948_vm0, %v2947_v1 }
0x1359   : > { %2747 = vmatprep.subr.bf16.mxu1 %v2947_v1 }
0x135c   : > { %2748 = vmatpush3.bf16.msra.mxu1 %v3106_v38 }
0x135d   : > { %2761 = vmatprep.subr.bf16.mxu1 %v2947_v1 }
0x1422   : > { %v1764_v34 = vpop.f32.mrb[44].mxu1 }
0x1423   : > { %v1810_v3 = vpop.f32.mrb[36].mxu0  ;;  %v2719_v5 = vpop.f32.mrb[45].mxu1 }
0x1424   : > { %v1811_v8 = vadd.f32 %v1810_v3, %v1764_v34  ;;  %v2727_v4 = vpop.f32.mrb[37].mxu0  ;;  %v1767_v6 = vpop.f32.mrb[46].mxu1 }
0x1425   : > { %v1813_v10 = vpop.f32.mrb[38].mxu0  ;;  %v2720_v11 = vpop.f32.mrb[47].mxu1  ;;  %v2039_v4 = vld [vmem:[#allocation2 + $0x8] sm:$0x1] }
0x1426   : > { %v1816_v12 = vadd.f32 %v1811_v8, %v3135_v50  ;;  %v2728_v37 = vpop.f32.mrb[39].mxu0  ;;  %v3439_v8 = vld [vmem:[%s3509_s6] sm:$0x1] }
0x1428   : > { %1824 = vrot.lane.b32.xlu0 %v1816_v12, %s2950_s18  ;;  %v2427_v18 = vmul.f32 -1.442695, %v1816_v12 }
0x142a   : > { %v1882_v14 = vpop.f32.mrb[48].mxu1  ;;  %2894 = vpow2.f32 %v2427_v18 }
0x142b   : > { %v1888_v15 = vadd.f32 %v1882_v14, %v1847_v13  ;;  %v2735_v16 = vpop.f32.mrb[49].mxu1 }
0x142c   : > { %v1885_v38 = vpop.f32.mrb[50].mxu1 }
0x142d   : > { %1896 = vrot.lane.b32.xlu1 %v1888_v15, %s2950_s18  ;;  %v2736_v17 = vpop.f32.mrb[51].mxu1  ;;  %v2429_v19 = vmul.f32 -1.442695, %v1888_v15 }
0x142f   : > { %2896 = vpow2.f32 %v2429_v19 }
0x1434   : > { %v2895_v35 = vpop.eup %2894 }
0x1435   : > { %v1820_v21 = vadd.f32 1.0, %v2895_v35 }
0x1437   : > { %2898 = vrcp.f32 %v1820_v21 }
0x1439   : > { %v2897_v22 = vpop.eup %2896 }
0x143a   : > { %v1892_v50 = vadd.f32 1.0, %v2897_v22 }
0x143c   : > { %2900 = vrcp.f32 %v1892_v50 }
0x1441   : > { %v2899_v23 = vpop.eup %2898 }
0x1442   : > { %v1834_v40 = vsub.f32 1.0, %v2899_v23  ;;  %v1840_v42 = vmul.f32 %v2899_v23, %v3345_v56 }
0x1446   : > { %v2901_v27 = vpop.eup %2900 }
0x1447   : > { %v1906_v45 = vsub.f32 1.0, %v2901_v27  ;;  %v1912_v48 = vmul.f32 %v2901_v27, %v3347_v57  ;;  %v2936_v57 = vld [vmem:[%s3507_s4] sm:$0xff]  }
0x149a   : > { %v1825_v25 = vpop.permute.xlu0 %1824 }
0x149b   : > { %v1827_v26 = vmul.f32 %v2899_v23, %v1825_v25 }
0x149d   : > { %1829 = vrot.lane.b32.xlu0 %v1827_v26, %s2951_s19 }
0x149f   : > { %v1897_v28 = vpop.permute.xlu1 %1896 }
0x14a0   : > { %v1899_v29 = vmul.f32 %v2901_v27, %v1897_v28 }
0x14a2   : > { %1901 = vrot.lane.b32.xlu1 %v1899_v29, %s2951_s19 }
0x150f   : > { %v1830_v30 = vpop.permute.xlu0 %1829 }
0x1510   : > { %v1832_v31 = vadd.f32 %v1830_v30, %v1816_v12 }
0x1512   : > { %2902 = vtanh.f32 %v1832_v31 }
0x1514   : > { %v1902_v32 = vpop.permute.xlu1 %1901 }
0x1515   : > { %v1904_v33 = vadd.f32 %v1902_v32, %v1888_v15 }
0x1517   : > { %2904 = vtanh.f32 %v1904_v33 }
0x151c   : > { %v2903_v36 = vpop.eup %2902 }
0x151d   : > { %1836 = vrot.lane.b32.xlu0 %v2903_v36, %s2952_s26 }
0x1521   : > { %v2905_v39 = vpop.eup %2904 }
0x1522   : > { %1908 = vrot.lane.b32.xlu1 %v2905_v39, %s2952_s26 }
0x158f   : > { %v1837_v41 = vpop.permute.xlu0 %1836 }
0x1590   : > { %v1839_v43 = vmul.f32 %v1837_v41, %v1834_v40 }
0x1592   : > { %v3399_v44 = vadd.f32 %v1840_v42, %v1839_v43 }
0x1594   : > { %v1909_v46 = vpop.permute.xlu1 %1908  ;;  %v1915_v47 = vpack.c.bf16 %v3399_v44, %v3399_v44 }
0x1595   : > { %v1911_v49 = vmul.f32 %v1909_v46, %v1906_v45 }
0x1596   : > { %1917 = vrot.lane.b32.xlu0 %v1915_v47, %s2952_s26 }
0x1597   : > { %v3405_v51 = vadd.f32 %v1912_v48, %v1911_v49 }
0x1599   : > { %v1914_v52 = vpack.c.bf16 %v3405_v51, %v3405_v51 }
0x159b   : > { %1963 = vrot.lane.b32.xlu1 %v1914_v52, %s2952_s26 }
0x1608   : > { %v1918_v53 = vpop.permute.xlu0 %1917 }
0x1609   : > { %2742 = vmatmul.mubr.msk.bf16.vlgmr.msra.gmra.mrb[40].mxu0 %vm482_vm1, %v1918_v53 }
0x160a   : > { %2754 = vmatpush3.bf16.msra.mxu0 %v3360_v63  ;;  %2757 = vmatprep.mubr.msk.bf16.mxu0 %vm2948_vm0, %v2947_v1 }
0x160b   : > { %2755 = vmatprep.subr.bf16.mxu0 %v2947_v1 }
0x160d   : > { %v1964_v54 = vpop.permute.xlu1 %1963 }
0x160e   : > { %2756 = vmatpush3.bf16.msra.mxu0 %v3373_v0  ;;  %2750 = vmatmul.mubr.msk.bf16.vlgmr.msra.gmra.mrb[52].mxu1 %vm482_vm1, %v1964_v54 }
0x160f   : > { %2769 = vmatprep.subr.bf16.mxu0 %v2947_v1  ;;  %2762 = vmatpush3.bf16.msra.mxu1 %v2935_v55 }
0x1610   : > { %2763 = vmatprep.subr.bf16.mxu1 %v2947_v1  ;;  %2765 = vmatprep.mubr.msk.bf16.mxu1 %vm2948_vm0, %v2947_v1 }
0x1611   : > { %2758 = vmatmul.mubr.msk.bf16.vlgmr.msra.gmra.mrb[44].mxu0 %vm482_vm1, %v1964_v54 }
0x1612   : > { %2770 = vmatpush3.bf16.msra.mxu0 %v2936_v57  ;;  %2773 = vmatprep.mubr.msk.bf16.mxu0 %vm2948_vm0, %v2947_v1 }
0x1613   : > { %2771 = vmatprep.subr.bf16.mxu0 %v2947_v1  ;;  %2764 = vmatpush3.bf16.msra.mxu1 %v3380_v2 }
0x1614   : > { %2777 = vmatprep.subr.bf16.mxu1 %v2947_v1 }
0x1616   : > { %2772 = vmatpush3.bf16.msra.mxu0 %v2937_v58 }
0x16dc   : > { %v1956_v60 = vpop.f32.mrb[40].mxu0 }
0x16dd   : > { %v2743_v61 = vpop.f32.mrb[41].mxu0 }
0x16de   : > { %v1959_v62 = vpop.f32.mrb[42].mxu0 }
0x16df   : > { %v2744_v63 = vpop.f32.mrb[43].mxu0 }
0x16e1   : > { %v2002_v0 = vpop.f32.mrb[52].mxu1 }
0x16e2   : > { %v2003_v34 = vadd.f32 %v2002_v0, %v1956_v60  ;;  %v2751_v3 = vpop.f32.mrb[53].mxu1 }
0x16e3   : > { %v2005_v5 = vpop.f32.mrb[54].mxu1 }
0x16e4   : > { %v2008_v2 = vadd.f32 %v3439_v8, %v2003_v34  ;;  %v2074_v6 = vpop.f32.mrb[44].mxu0  ;;  %v2752_v10 = vpop.f32.mrb[55].mxu1 }
0x16e5   : > { %v2080_v11 = vadd.f32 %v2074_v6, %v2039_v4  ;;  %v2759_v12 = vpop.f32.mrb[45].mxu0 }
0x16e6   : > { %v2077_v37 = vpop.f32.mrb[46].mxu0  ;;  %2016 = vrot.lane.b32.xlu0 %v2008_v2, %s2950_s18  ;;  %v2432_v14 = vmul.f32 -1.442695, %v2008_v2 }
0x16e7   : > { %2088 = vrot.lane.b32.xlu1 %v2080_v11, %s2950_s18  ;;  %v2760_v13 = vpop.f32.mrb[47].mxu0  ;;  %v2434_v15 = vmul.f32 -1.442695, %v2080_v11 }
0x16e8   : > { %2906 = vpow2.f32 %v2432_v14 }
0x16e9   : > { %2908 = vpow2.f32 %v2434_v15 }
0x16f2   : > { %v2907_v16 = vpop.eup %2906 }
0x16f3   : > { %v2909_v38 = vpop.eup %2908  ;;  %v2012_v17 = vadd.f32 1.0, %v2907_v16 }
0x16f4   : > { %v2084_v18 = vadd.f32 1.0, %v2909_v38 }
0x16f5   : > { %2910 = vrcp.f32 %v2012_v17 }
0x16f6   : > { %2912 = vrcp.f32 %v2084_v18 }
0x16ff   : > { %v2911_v19 = vpop.eup %2910 }
0x1700   : > { %v2913_v21 = vpop.eup %2912  ;;  %v2026_v31 = vsub.f32 1.0, %v2911_v19  ;;  %v2032_v36 = vmul.f32 %v2911_v19, %v3399_v44 }
0x1701   : > { %v2098_v33 = vsub.f32 1.0, %v2913_v21  ;;  %v2104_v41 = vmul.f32 %v2913_v21, %v3405_v51 }
0x1758   : > { %v2017_v35 = vpop.permute.xlu0 %2016 }
0x1759   : > { %v2019_v22 = vmul.f32 %v2911_v19, %v2017_v35  ;;  %v2089_v50 = vpop.permute.xlu1 %2088  ;;  %v2438_v19 = vld [vmem:[%s3511_s8] ss:$0 sm:$0xff] }
0x175a   : > { %v2091_v23 = vmul.f32 %v2913_v21, %v2089_v50 }
0x175b   : > { %2021 = vrot.lane.b32.xlu0 %v2019_v22, %s2951_s19 }
0x175c   : > { %2093 = vrot.lane.b32.xlu1 %v2091_v23, %s2951_s19 }
0x17cd   : > { %v2022_v25 = vpop.permute.xlu0 %2021 }
0x17ce   : > { %v2024_v26 = vadd.f32 %v2022_v25, %v2008_v2  ;;  %v2094_v27 = vpop.permute.xlu1 %2093 }
0x17cf   : > { %v2096_v28 = vadd.f32 %v2094_v27, %v2080_v11 }
0x17d0   : > { %2914 = vtanh.f32 %v2024_v26 }
0x17d1   : > { %2916 = vtanh.f32 %v2096_v28 }
0x17da   : > { %v2915_v29 = vpop.eup %2914 }
0x17db   : > { %v2917_v30 = vpop.eup %2916  ;;  %2028 = vrot.lane.b32.xlu0 %v2915_v29, %s2952_s26 }
0x17dc   : > { %2100 = vrot.lane.b32.xlu1 %v2917_v30, %s2952_s26 }
0x184d   : > { %v2029_v32 = vpop.permute.xlu0 %2028 }
0x184e   : > { %v2031_v39 = vmul.f32 %v2029_v32, %v2026_v31  ;;  %v2101_v40 = vpop.permute.xlu1 %2100 }
0x184f   : > { %v2103_v42 = vmul.f32 %v2101_v40, %v2098_v33 }
0x1850   : > { %v2033_v43 = vadd.f32 %v2032_v36, %v2031_v39 }
0x1851   : > { %v2105_v45 = vadd.f32 %v2104_v41, %v2103_v42 }
0x1852   : > { %v2107_v46 = vpack.c.bf16 %v2033_v43, %v2033_v43 }
0x1853   : > { %v2106_v47 = vpack.c.bf16 %v2105_v45, %v2105_v45 }
0x1854   : > { %2109 = vrot.lane.b32.xlu0 %v2107_v46, %s2952_s26 }
0x1855   : > { %2155 = vrot.lane.b32.xlu1 %v2106_v47, %s2952_s26 }
0x18c6   : > { %v2110_v48 = vpop.permute.xlu0 %2109 }
0x18c7   : > { %v2156_v49 = vpop.permute.xlu1 %2155  ;;  %2766 = vmatmul.mubr.msk.bf16.vlgmr.msra.gmra.mrb[56].mxu1 %vm482_vm1, %v2110_v48 }
0x18c8   : > { %2774 = vmatmul.mubr.msk.bf16.vlgmr.msra.gmra.mrb[48].mxu0 %vm482_vm1, %v2156_v49  ;;  %2781 = vmatprep.mubr.msk.bf16.mxu1 %vm2948_vm0, %v2947_v1 }
0x199a   : > { %v2148_v52 = vpop.f32.mrb[56].mxu1 }
0x199b   : > { %v2194_v51 = vpop.f32.mrb[48].mxu0  ;;  %v2767_v53 = vpop.f32.mrb[57].mxu1 }
0x199c   : > { %v2195_v54 = vadd.f32 %v2194_v51, %v2148_v52  ;;  %v2775_v55 = vpop.f32.mrb[49].mxu0  ;;  %v2151_v57 = vpop.f32.mrb[58].mxu1 }
0x199d   : > { %v2197_v58 = vpop.f32.mrb[50].mxu0  ;;  %v2768_v60 = vpop.f32.mrb[59].mxu1 }
0x199e   : > { %v2200_v61 = vadd.f32 %v3439_v8, %v2195_v54  ;;  %v2776_v62 = vpop.f32.mrb[51].mxu0 }
0x19a0   : > { %2208 = vrot.lane.b32.xlu0 %v2200_v61, %s2950_s18  ;;  %v2437_v63 = vmul.f32 -1.442695, %v2200_v61 }
0x19a2   : > { %2918 = vpow2.f32 %v2437_v63 }
0x19ac   : > { %v2919_v0 = vpop.eup %2918 }
0x19ad   : > { %v2204_v34 = vadd.f32 1.0, %v2919_v0 }
0x19af   : > { %2920 = vrcp.f32 %v2204_v34 }
0x19b9   : > { %v2921_v3 = vpop.eup %2920 }
0x1a12   : > { %v2209_v5 = vpop.permute.xlu0 %2208 }
0x1a13   : > { %v2211_v2 = vmul.f32 %v2921_v3, %v2209_v5 }
0x1a15   : > { %2213 = vrot.lane.b32.xlu1 %v2211_v2, %s2951_s19 }
0x1a19   : > { %690 = vrot.lane.b32.xlu1 %v3144_v24, %s2952_s26 }
0x1a1d   : > { %1075 = vrot.lane.b32.xlu1 %v3224_v9, %s2952_s26 }
0x1a21   : > { %1459 = vrot.lane.b32.xlu1 %v3304_v59, %s2952_s26  ;;  %v2814_v59 = vld [vmem:[%s3510_s7] sm:$0xff]  }
0x1a22   : > { %2778 = vmatpush3.bf16.msra.mxu1 %v2814_v59 }
0x1a23   : > { %2779 = vmatprep.subr.bf16.mxu1 %v2947_v1 }
0x1a25   : > { %1843 = vrot.lane.b32.xlu1 %v3399_v44, %s2952_s26  ;;  %v2815_v44 = vld [vmem:[%s3510_s7 + $0x8] sm:$0xff]  }
0x1a26   : > { %2780 = vmatpush3.bf16.msra.mxu1 %v2815_v44 }
0x1a87   : > { %v2214_v8 = vpop.permute.xlu1 %2213 }
0x1a88   : > { %v2216_v4 = vadd.f32 %v2214_v8, %v2200_v61 }
0x1a8a   : > { %2922 = vtanh.f32 %v2216_v4 }
0x1a8b   : > { %v691_v6 = vpop.permute.xlu1 %690 }
0x1a8c   : > { %694 = vst.msk [vmem:[#allocation3] sm:$0x1] %vm693_vm2, %v691_v6 }
0x1a8f   : > { %v1076_v10 = vpop.permute.xlu1 %1075 }
0x1a90   : > { %1078 = vst.msk [vmem:[#allocation3 + $0x2] sm:$0x1] %vm693_vm2, %v1076_v10 }
0x1a93   : > { %v1460_v24 = vpop.permute.xlu1 %1459 }
0x1a94   : > { %v2923_v11 = vpop.eup %2922  ;;  %1462 = vst.msk [vmem:[#allocation3 + $0x4] sm:$0x1] %vm693_vm2, %v1460_v24 }
0x1a95   : > { %2220 = vrot.lane.b32.xlu0 %v2923_v11, %s2952_s26 }
0x1a97   : > { %v1844_v9 = vpop.permute.xlu1 %1843 }
0x1a98   : > { %1846 = vst.msk [vmem:[#allocation3 + $0x6] sm:$0x1] %vm693_vm2, %v1844_v9 }
0x1a99   : > { %883 = vrot.lane.b32.xlu0 %v3185_v20, %s2952_s26  ;;  %v2218_v20 = vsub.f32 1.0, %v2921_v3 }
0x1a9d   : > { %1267 = vrot.lane.b32.xlu0 %v3265_v7, %s2952_s26  ;;  %v2224_v7 = vmul.f32 %v2921_v3, %v2033_v43 }
0x1aa1   : > { %1651 = vrot.lane.b32.xlu0 %v3345_v56, %s2952_s26 }
0x1aa5   : > { %2035 = vrot.lane.b32.xlu0 %v2033_v43, %s2952_s26 }
0x1b07   : > { %v2221_v12 = vpop.permute.xlu0 %2220 }
0x1b08   : > { %v2223_v37 = vmul.f32 %v2221_v12, %v2218_v20 }
0x1b0a   : > { %v2225_v13 = vadd.f32 %v2224_v7, %v2223_v37 }
0x1b0b   : > { %v884_v56 = vpop.permute.xlu0 %883 }
0x1b0c   : > { %886 = vst.msk [vmem:[#allocation3 + $0x1] sm:$0x1] %vm693_vm2, %v884_v56  ;;  %2227 = vrot.lane.b32.xlu1 %v2225_v13, %s2952_s26  ;;  %s2447_s26 = sshll.u32 %s3514_s10, 4 }
0x1b0d   : > { %s332_s16 = scalar_lea.vmem %s3512_s9, %s2447_s26 }
0x1b0f   : > { %v1268_v14 = vpop.permute.xlu0 %1267 }
0x1b10   : > { %1270 = vst.msk [vmem:[#allocation3 + $0x3] sm:$0x1] %vm693_vm2, %v1268_v14 }
0x1b13   : > { %v1652_v15 = vpop.permute.xlu0 %1651 }
0x1b14   : > { %1654 = vst.msk [vmem:[#allocation3 + $0x5] sm:$0x1] %vm693_vm2, %v1652_v15 }
0x1b17   : > { %v2036_v16 = vpop.permute.xlu0 %2035 }
0x1b18   : > { %2038 = vst.msk [vmem:[#allocation3 + $0x7] sm:$0x1] %vm693_vm2, %v2036_v16 }
0x1b1f   : > { %v2231_v38 = vld [vmem:[#allocation3] sm:$0xff] }
0x1b7e   : > { %v2228_v1 = vpop.permute.xlu1 %2227 }
0x1b7f   : > { %2230 = vst.msk [vmem:[#allocation3 + $0x8] sm:$0x1] %vm693_vm2, %v2228_v1 }
0x1b86   : > { %v2232_v17 = vld [vmem:[#allocation3 + $0x8] sm:$0x1] }
0x1b87   : > { %v2233_v18 = vpack.c.bf16 %v2232_v17, %v2231_v38 }
0x1b89   : > { %2782 = vmatmul.mubr.msk.bf16.vlgmr.msra.gmra.mrb[60].mxu1 %vm482_vm1, %v2233_v18 }
0x1c5c   : > { %v2294_v35 = vpop.f32.mrb[60].mxu1 }
0x1c5d   : > { %v2295_v21 = vadd.f32 %v2438_v19, %v2294_v35  ;;  %v2783_v22 = vpop.f32.mrb[61].mxu1 }
0x1c5e   : > { %v2297_v50 = vpop.f32.mrb[62].mxu1 }
0x1c5f   : > { %v2442_v23 = vmul.f32 -1.442695, %v2295_v21  ;;  %v2298_v25 = vadd.f32 %v2438_v19, %v2297_v50  ;;  %v2784_v26 = vpop.f32.mrb[63].mxu1 }
0x1c61   : > { %2924 = vpow2.f32 %v2442_v23  ;;  %v2443_v27 = vmul.f32 -1.442695, %v2298_v25 }
0x1c63   : > { %2926 = vpow2.f32 %v2443_v27 }
0x1c6b   : > { %v2925_v28 = vpop.eup %2924 }
0x1c6c   : > { %v2307_v29 = vadd.f32 1.0, %v2925_v28 }
0x1c6d   : > { %v2927_v30 = vpop.eup %2926 }
0x1c6e   : > { %2928 = vrcp.f32 %v2307_v29  ;;  %v2308_v31 = vadd.f32 1.0, %v2927_v30 }
0x1c70   : > { %2930 = vrcp.f32 %v2308_v31 }
0x1c78   : > { %v2929_v32 = vpop.eup %2928 }
0x1c79   : > { %2313 = vst [vmem:[%s332_s16] sm:$0xff] %v2929_v32 }
0x1c7a   : > { %v2931_v33 = vpop.eup %2930 }
0x1c7b   : > { %2314 = vst [vmem:[%s332_s16 + $0x8] sm:$0x1] %v2931_v33 }
0x1c7c PF: > { %s19_s30 = sadd.s32 1, %s2945_s30  }
0x1c7d   : > { %p16_p4 = scmp.ge.s32.totalorder %s19_s30, 4  }
0x1c7f   :  { %18 = sbr.rel (!%p16_p4) target bundleno = 1 (0x1), region = 86 }

</bundles_post_ra>
